<compile_context>
chip_gen: v7x
topology: tpu7x:2x2x1
jax: 0.10.0
libtpu: 0.0.40
codegen_flags: <defaults>
</compile_context>

<pallas_src>
import jax
import jax.numpy as jnp
from jax.experimental import pallas as pl
from jax.experimental.pallas import tpu as pltpu


# ---------------------------------------------------------------------------
# Fused kernel
# ---------------------------------------------------------------------------
def _mnist_fused_kernel(x_ref, w1_ref, b1_ref, s1_ref, o1_ref,
                        w2_ref, b2_ref, s2_ref, o2_ref,
                        wa_ref, ba_ref, wb_ref, bb_ref, out_ref):
    x = x_ref[...]                                   # (TB, 28, 28) f32
    tb = x.shape[0]

    # ---- Conv2d(1, 6, 3) as ONE MXU matmul against a banded weight matrix.
    # K axis = (row-shift di, w_in); result lanes = (w_out, c_out), c fastest.
    xc = jnp.concatenate([x[:, di:di + 26, :] for di in range(3)], axis=-1)   # (TB,26,84)
    y = jnp.dot(xc.reshape(tb * 26, 84), w1_ref[...],
                preferred_element_type=jnp.float32) + b1_ref[...]             # (TB*26,156)
    y = jnp.maximum(y, 0.0)                          # ReLU
    y = y * s1_ref[...] + o1_ref[...]                # BatchNorm2d (eval, folded)
    y = y.reshape(tb, 26, 156)                       # logical (TB, 26, 26, 6)

    # ---- MaxPool2d(2, 2): rows via reshape+max, cols via 6-wide lane slices.
    yh = y.reshape(tb, 13, 2, 156)
    y = jnp.maximum(yh[:, :, 0, :], yh[:, :, 1, :])                           # (TB,13,156)
    y = jnp.maximum(
        jnp.concatenate([y[:, :, 12 * j:12 * j + 6] for j in range(13)], axis=-1),
        jnp.concatenate([y[:, :, 12 * j + 6:12 * j + 12] for j in range(13)], axis=-1),
    )                                                # (TB,13,78) = logical (TB,13,13,6)

    # ---- Conv2d(6, 16, 3) as ONE MXU matmul (K = (di, w_in, c_in) = 234).
    pc = jnp.concatenate([y[:, di:di + 11, :] for di in range(3)], axis=-1)   # (TB,11,234)
    z = jnp.dot(pc.reshape(tb * 11, 234), w2_ref[...],
                preferred_element_type=jnp.float32) + b2_ref[...]             # (TB*11,176)
    z = jnp.maximum(z, 0.0)
    z = z * s2_ref[...] + o2_ref[...]
    z = z.reshape(tb, 11, 176)                       # logical (TB, 11, 11, 16)

    # ---- MaxPool2d(2, 2), floor mode (11 -> 5).
    zh = z[:, :10, :].reshape(tb, 5, 2, 176)
    z = jnp.maximum(zh[:, :, 0, :], zh[:, :, 1, :])                           # (TB,5,176)
    z = jnp.maximum(
        jnp.concatenate([z[:, :, 32 * j:32 * j + 16] for j in range(5)], axis=-1),
        jnp.concatenate([z[:, :, 32 * j + 16:32 * j + 32] for j in range(5)], axis=-1),
    )                                                # (TB,5,80) = logical (TB,5,5,16)

    # ---- Flatten in (h, w, c) order; fc1's weight rows were pre-permuted so
    # this matches PyTorch's nn.Flatten order on NCHW features.
    f = jnp.concatenate([z[:, h, :] for h in range(5)], axis=-1)              # (TB,400)

    # ---- Linear(400,128) -> ReLU -> Linear(128, 10 padded to 128) -> Softmax.
    h1 = jnp.maximum(
        jnp.dot(f, wa_ref[...], preferred_element_type=jnp.float32) + ba_ref[...], 0.0)
    logits = jnp.dot(h1, wb_ref[...], preferred_element_type=jnp.float32) + bb_ref[...]
    m = jnp.max(logits, axis=-1, keepdims=True)
    e = jnp.exp(logits - m)                          # padded lanes: exp(-1e30-m) == 0
    out_ref[...] = e / jnp.sum(e, axis=-1, keepdims=True)                     # (TB,128)


# ---------------------------------------------------------------------------
# Wrapper-side weight preparation (plain JAX on tiny tensors)
# ---------------------------------------------------------------------------
def _fold_bn(gamma, beta, mean, var, eps=1e-5):
    s = gamma * jax.lax.rsqrt(var + eps)
    return s, beta - mean * s


def _conv_band_matrix(w, w_in, w_out):
    """PyTorch conv weight (Cout, Cin, 3, 3) -> (3*W_in*Cin, W_out*Cout).

    Row index = (di, w_in, c_in); column index = (w_out, c_out).  Multiplying
    the row-shifted input slab [concat_di x[:, di:di+H_out, :]] by this matrix
    computes the full 'valid' 3x3 convolution on the MXU.
    """
    cout, cin, kh, kw = w.shape
    wk = jnp.transpose(w, (2, 3, 1, 0))              # (kh, kw, cin, cout)
    wi = jnp.arange(w_in)
    wo = jnp.arange(w_out)
    dj = wi[:, None] - wo[None, :]                   # (W_in, W_out)
    valid = (dj >= 0) & (dj < kw)
    djc = jnp.clip(dj, 0, kw - 1)
    blocks = []
    for di in range(kh):
        t = wk[di][djc]                              # (W_in, W_out, cin, cout)
        t = jnp.where(valid[:, :, None, None], t, 0.0)
        t = jnp.transpose(t, (0, 2, 1, 3))           # (W_in, cin, W_out, cout)
        blocks.append(t.reshape(w_in * cin, w_out * cout))
    return jnp.concatenate(blocks, axis=0)           # (kh*W_in*cin, W_out*cout)


@jax.jit
def mnist_forward(x_nchw, params):
    B = x_nchw.shape[0]
    x = x_nchw.astype(jnp.float32).reshape(B, 28, 28)          # Cin == 1: drop channel axis

    # Conv weights as banded im2col matrices.
    w1 = _conv_band_matrix(params["conv1_w"], 28, 26)          # (84, 156)
    w2 = _conv_band_matrix(params["conv2_w"], 13, 11)          # (234, 176)

    # Eval-mode BatchNorm folded to scale/shift; per-channel vectors tiled to
    # the lane-dense (w, c) layout.
    s1, o1 = _fold_bn(params["bn1_gamma"], params["bn1_beta"],
                      params["bn1_mean"], params["bn1_var"])
    s2, o2 = _fold_bn(params["bn2_gamma"], params["bn2_beta"],
                      params["bn2_mean"], params["bn2_var"])
    b1 = jnp.tile(params["conv1_b"], 26).reshape(1, 156)
    s1 = jnp.tile(s1, 26).reshape(1, 156)
    o1 = jnp.tile(o1, 26).reshape(1, 156)
    b2 = jnp.tile(params["conv2_b"], 11).reshape(1, 176)
    s2 = jnp.tile(s2, 11).reshape(1, 176)
    o2 = jnp.tile(o2, 11).reshape(1, 176)

    # fc1: permute weight rows so the in-kernel (h, w, c) flatten matches
    # PyTorch's NCHW nn.Flatten index c*25 + h*5 + w.
    hh = jnp.arange(5)[:, None, None]
    ww = jnp.arange(5)[None, :, None]
    cc = jnp.arange(16)[None, None, :]
    torch_idx = (cc * 25 + hh * 5 + ww).reshape(400)
    wa = jnp.transpose(params["fc1_w"])[torch_idx]             # (400, 128)
    ba = params["fc1_b"].reshape(1, 128)

    # fc2: pad the 10-wide head to a lane-dense 128; padded logits get a very
    # negative bias so they contribute exactly 0 to the softmax.
    wb = jnp.pad(jnp.transpose(params["fc2_w"]), ((0, 0), (0, 118)))          # (128,128)
    bb = jnp.pad(params["fc2_b"], (0, 118), constant_values=-1e30).reshape(1, 128)

    # Batch tiling over a parallel grid axis.
    TB = B if B <= 128 else 128
    b_pad = -(-B // TB) * TB
    if b_pad != B:
        x = jnp.pad(x, ((0, b_pad - B), (0, 0), (0, 0)))

    full2d = lambda b: (0, 0)
    out = pl.pallas_call(
        _mnist_fused_kernel,
        out_shape=jax.ShapeDtypeStruct((b_pad, 128), jnp.float32),
        grid=(b_pad // TB,),
        in_specs=[
            pl.BlockSpec((TB, 28, 28), lambda b: (b, 0, 0)),
            pl.BlockSpec((84, 156), full2d), pl.BlockSpec((1, 156), full2d),
            pl.BlockSpec((1, 156), full2d), pl.BlockSpec((1, 156), full2d),
            pl.BlockSpec((234, 176), full2d), pl.BlockSpec((1, 176), full2d),
            pl.BlockSpec((1, 176), full2d), pl.BlockSpec((1, 176), full2d),
            pl.BlockSpec((400, 128), full2d), pl.BlockSpec((1, 128), full2d),
            pl.BlockSpec((128, 128), full2d), pl.BlockSpec((1, 128), full2d),
        ],
        out_specs=pl.BlockSpec((TB, 128), lambda b: (b, 0)),
        compiler_params=pltpu.CompilerParams(dimension_semantics=("parallel",)),
    )(x, w1, b1, s1, o1, w2, b2, s2, o2, wa, ba, wb, bb)

    return out[:B, :10]


# ---------------------------------------------------------------------------
# Parameters / self-test
# ---------------------------------------------------------------------------
def init_params(key):
    ks = jax.random.split(key, 14)
    f32 = jnp.float32

    def n(k, shape, scale):
        return scale * jax.random.normal(k, shape, f32)

    return {
        # nn.Conv2d(1, 6, 3)
        "conv1_w": n(ks[0], (6, 1, 3, 3), 0.3),
        "conv1_b": n(ks[1], (6,), 0.1),
        # nn.BatchNorm2d(6) (eval-mode params)
        "bn1_gamma": 1.0 + n(ks[2], (6,), 0.1),
        "bn1_beta": n(ks[3], (6,), 0.1),
        "bn1_mean": n(ks[4], (6,), 0.1),
        "bn1_var": jax.random.uniform(ks[5], (6,), f32, 0.5, 1.5),
        # nn.Conv2d(6, 16, 3)
        "conv2_w": n(ks[6], (16, 6, 3, 3), 0.2),
        "conv2_b": n(ks[7], (16,), 0.1),
        # nn.BatchNorm2d(16)
        "bn2_gamma": 1.0 + n(ks[8], (16,), 0.1),
        "bn2_beta": n(ks[9], (16,), 0.1),
        "bn2_mean": n(ks[10], (16,), 0.1),
        "bn2_var": jax.random.uniform(ks[11], (16,), f32, 0.5, 1.5),
        # nn.Linear(400, 128), nn.Linear(128, 10)
        "fc1_w": n(ks[12], (128, 400), 0.05),
        "fc1_b": jnp.zeros((128,), f32),
        "fc2_w": n(ks[13], (10, 128), 0.05),
        "fc2_b": jnp.zeros((10,), f32),
    }


if __name__ == "__main__":
    key = jax.random.PRNGKey(0)
    pkey, xkey = jax.random.split(key)
    params = init_params(pkey)
    # MNIST-shaped input: the Linear(400, ...) head requires 28x28 spatial.
    x = jax.random.normal(xkey, (2, 1, 28, 28), jnp.float32)

    probs = mnist_forward(x, params)
    probs = jax.block_until_ready(probs)

    assert probs.shape == (2, 10)
    assert bool(jnp.all(jnp.isfinite(probs)))
    assert bool(jnp.all(jnp.abs(jnp.sum(probs, axis=-1) - 1.0) < 1e-3))
    print("KERNEL_OK")
</pallas_src>

<mosaic_0001>
module attributes {stable_mosaic.version = 11 : i64} {
  func.func @_mnist_fused_kernel(%arg0: i32, %arg1: memref<2x28x28xf32, #tpu.memory_space<vmem>>, %arg2: memref<84x156xf32, #tpu.memory_space<vmem>>, %arg3: memref<1x156xf32, #tpu.memory_space<vmem>>, %arg4: memref<1x156xf32, #tpu.memory_space<vmem>>, %arg5: memref<1x156xf32, #tpu.memory_space<vmem>>, %arg6: memref<234x176xf32, #tpu.memory_space<vmem>>, %arg7: memref<1x176xf32, #tpu.memory_space<vmem>>, %arg8: memref<1x176xf32, #tpu.memory_space<vmem>>, %arg9: memref<1x176xf32, #tpu.memory_space<vmem>>, %arg10: memref<400x128xf32, #tpu.memory_space<vmem>>, %arg11: memref<1x128xf32, #tpu.memory_space<vmem>>, %arg12: memref<128x128xf32, #tpu.memory_space<vmem>>, %arg13: memref<1x128xf32, #tpu.memory_space<vmem>>, %arg14: memref<2x128xf32, #tpu.memory_space<vmem>>) attributes {dimension_semantics = [#tpu.dimension_semantics<parallel>], iteration_bounds = array<i64: 1>, scalar_prefetch = 0 : i64, scratch_operands = 0 : i64, tpu.core_type = #tpu.core_type<tc>, window_params = [{transform_indices = @transform_0, window_bounds = array<i64: 2, 28, 28>}, {pipeline_mode = #tpu.pipeline_mode<synchronous>, transform_indices = @transform_1, window_bounds = array<i64: 84, 156>}, {pipeline_mode = #tpu.pipeline_mode<synchronous>, transform_indices = @transform_2, window_bounds = array<i64: 1, 156>}, {pipeline_mode = #tpu.pipeline_mode<synchronous>, transform_indices = @transform_3, window_bounds = array<i64: 1, 156>}, {pipeline_mode = #tpu.pipeline_mode<synchronous>, transform_indices = @transform_4, window_bounds = array<i64: 1, 156>}, {pipeline_mode = #tpu.pipeline_mode<synchronous>, transform_indices = @transform_5, window_bounds = array<i64: 234, 176>}, {pipeline_mode = #tpu.pipeline_mode<synchronous>, transform_indices = @transform_6, window_bounds = array<i64: 1, 176>}, {pipeline_mode = #tpu.pipeline_mode<synchronous>, transform_indices = @transform_7, window_bounds = array<i64: 1, 176>}, {pipeline_mode = #tpu.pipeline_mode<synchronous>, transform_indices = @transform_8, window_bounds = array<i64: 1, 176>}, {pipeline_mode = #tpu.pipeline_mode<synchronous>, transform_indices = @transform_9, window_bounds = array<i64: 400, 128>}, {pipeline_mode = #tpu.pipeline_mode<synchronous>, transform_indices = @transform_10, window_bounds = array<i64: 1, 128>}, {pipeline_mode = #tpu.pipeline_mode<synchronous>, transform_indices = @transform_11, window_bounds = array<i64: 128, 128>}, {pipeline_mode = #tpu.pipeline_mode<synchronous>, transform_indices = @transform_12, window_bounds = array<i64: 1, 128>}, {transform_indices = @transform_13, window_bounds = array<i64: 2, 128>}]} {
    %c0 = arith.constant 0 : index
    %c0_0 = arith.constant 0 : index
    %c0_1 = arith.constant 0 : index
    %0 = vector.load %arg1[%c0, %c0_0, %c0_1] : memref<2x28x28xf32, #tpu.memory_space<vmem>>, vector<2x28x28xf32>
    %1 = vector.extract_strided_slice %0 {offsets = [0, 0, 0], sizes = [2, 26, 28], strides = [1, 1, 1]} : vector<2x28x28xf32> to vector<2x26x28xf32>
    %2 = vector.extract_strided_slice %0 {offsets = [0, 1, 0], sizes = [2, 26, 28], strides = [1, 1, 1]} : vector<2x28x28xf32> to vector<2x26x28xf32>
    %3 = vector.extract_strided_slice %0 {offsets = [0, 2, 0], sizes = [2, 26, 28], strides = [1, 1, 1]} : vector<2x28x28xf32> to vector<2x26x28xf32>
    %4 = tpu.concatenate %1, %2, %3 in 2 : vector<2x26x28xf32>, vector<2x26x28xf32>, vector<2x26x28xf32> -> vector<2x26x84xf32>
    %5 = vector.shape_cast %4 : vector<2x26x84xf32> to vector<52x84xf32>
    %c0_2 = arith.constant 0 : index
    %c0_3 = arith.constant 0 : index
    %6 = vector.load %arg2[%c0_2, %c0_3] : memref<84x156xf32, #tpu.memory_space<vmem>>, vector<84x156xf32>
    %cst = arith.constant dense<0.000000e+00> : vector<52x156xf32>
    %7 = tpu.matmul %5, %6, %cst {dimension_numbers = #tpu.dot_dimension_numbers<[1], [0], [0], [1], [0, 0, 1, 1], [], []>} : vector<52x84xf32>, vector<84x156xf32>, vector<52x156xf32> -> vector<52x156xf32>
    %c0_4 = arith.constant 0 : index
    %c0_5 = arith.constant 0 : index
    %8 = vector.load %arg3[%c0_4, %c0_5] : memref<1x156xf32, #tpu.memory_space<vmem>>, vector<1x156xf32>
    %9 = vector.broadcast %8 : vector<1x156xf32> to vector<52x156xf32>
    %10 = arith.addf %7, %9 : vector<52x156xf32>
    %cst_6 = arith.constant 0.000000e+00 : f32
    %11 = vector.broadcast %cst_6 : f32 to vector<52x156xf32>
    %12 = arith.maximumf %10, %11 : vector<52x156xf32>
    %c0_7 = arith.constant 0 : index
    %c0_8 = arith.constant 0 : index
    %13 = vector.load %arg4[%c0_7, %c0_8] : memref<1x156xf32, #tpu.memory_space<vmem>>, vector<1x156xf32>
    %14 = vector.broadcast %13 : vector<1x156xf32> to vector<52x156xf32>
    %15 = arith.mulf %12, %14 : vector<52x156xf32>
    %c0_9 = arith.constant 0 : index
    %c0_10 = arith.constant 0 : index
    %16 = vector.load %arg5[%c0_9, %c0_10] : memref<1x156xf32, #tpu.memory_space<vmem>>, vector<1x156xf32>
    %17 = vector.broadcast %16 : vector<1x156xf32> to vector<52x156xf32>
    %18 = arith.addf %15, %17 : vector<52x156xf32>
    %19 = vector.shape_cast %18 : vector<52x156xf32> to vector<2x26x156xf32>
    %20 = vector.shape_cast %19 : vector<2x26x156xf32> to vector<2x13x2x156xf32>
    %21 = vector.extract_strided_slice %20 {offsets = [0, 0, 0, 0], sizes = [2, 13, 1, 156], strides = [1, 1, 1, 1]} : vector<2x13x2x156xf32> to vector<2x13x1x156xf32>
    %22 = vector.shape_cast %21 : vector<2x13x1x156xf32> to vector<2x13x156xf32>
    %23 = vector.extract_strided_slice %20 {offsets = [0, 0, 1, 0], sizes = [2, 13, 1, 156], strides = [1, 1, 1, 1]} : vector<2x13x2x156xf32> to vector<2x13x1x156xf32>
    %24 = vector.shape_cast %23 : vector<2x13x1x156xf32> to vector<2x13x156xf32>
    %25 = arith.maximumf %22, %24 : vector<2x13x156xf32>
    %26 = vector.extract_strided_slice %25 {offsets = [0, 0, 0], sizes = [2, 13, 6], strides = [1, 1, 1]} : vector<2x13x156xf32> to vector<2x13x6xf32>
    %27 = vector.extract_strided_slice %25 {offsets = [0, 0, 12], sizes = [2, 13, 6], strides = [1, 1, 1]} : vector<2x13x156xf32> to vector<2x13x6xf32>
    %28 = vector.extract_strided_slice %25 {offsets = [0, 0, 24], sizes = [2, 13, 6], strides = [1, 1, 1]} : vector<2x13x156xf32> to vector<2x13x6xf32>
    %29 = vector.extract_strided_slice %25 {offsets = [0, 0, 36], sizes = [2, 13, 6], strides = [1, 1, 1]} : vector<2x13x156xf32> to vector<2x13x6xf32>
    %30 = vector.extract_strided_slice %25 {offsets = [0, 0, 48], sizes = [2, 13, 6], strides = [1, 1, 1]} : vector<2x13x156xf32> to vector<2x13x6xf32>
    %31 = vector.extract_strided_slice %25 {offsets = [0, 0, 60], sizes = [2, 13, 6], strides = [1, 1, 1]} : vector<2x13x156xf32> to vector<2x13x6xf32>
    %32 = vector.extract_strided_slice %25 {offsets = [0, 0, 72], sizes = [2, 13, 6], strides = [1, 1, 1]} : vector<2x13x156xf32> to vector<2x13x6xf32>
    %33 = vector.extract_strided_slice %25 {offsets = [0, 0, 84], sizes = [2, 13, 6], strides = [1, 1, 1]} : vector<2x13x156xf32> to vector<2x13x6xf32>
    %34 = vector.extract_strided_slice %25 {offsets = [0, 0, 96], sizes = [2, 13, 6], strides = [1, 1, 1]} : vector<2x13x156xf32> to vector<2x13x6xf32>
    %35 = vector.extract_strided_slice %25 {offsets = [0, 0, 108], sizes = [2, 13, 6], strides = [1, 1, 1]} : vector<2x13x156xf32> to vector<2x13x6xf32>
    %36 = vector.extract_strided_slice %25 {offsets = [0, 0, 120], sizes = [2, 13, 6], strides = [1, 1, 1]} : vector<2x13x156xf32> to vector<2x13x6xf32>
    %37 = vector.extract_strided_slice %25 {offsets = [0, 0, 132], sizes = [2, 13, 6], strides = [1, 1, 1]} : vector<2x13x156xf32> to vector<2x13x6xf32>
    %38 = vector.extract_strided_slice %25 {offsets = [0, 0, 144], sizes = [2, 13, 6], strides = [1, 1, 1]} : vector<2x13x156xf32> to vector<2x13x6xf32>
    %39 = tpu.concatenate %26, %27, %28, %29, %30, %31, %32, %33, %34, %35, %36, %37, %38 in 2 : vector<2x13x6xf32>, vector<2x13x6xf32>, vector<2x13x6xf32>, vector<2x13x6xf32>, vector<2x13x6xf32>, vector<2x13x6xf32>, vector<2x13x6xf32>, vector<2x13x6xf32>, vector<2x13x6xf32>, vector<2x13x6xf32>, vector<2x13x6xf32>, vector<2x13x6xf32>, vector<2x13x6xf32> -> vector<2x13x78xf32>
    %40 = vector.extract_strided_slice %25 {offsets = [0, 0, 6], sizes = [2, 13, 6], strides = [1, 1, 1]} : vector<2x13x156xf32> to vector<2x13x6xf32>
    %41 = vector.extract_strided_slice %25 {offsets = [0, 0, 18], sizes = [2, 13, 6], strides = [1, 1, 1]} : vector<2x13x156xf32> to vector<2x13x6xf32>
    %42 = vector.extract_strided_slice %25 {offsets = [0, 0, 30], sizes = [2, 13, 6], strides = [1, 1, 1]} : vector<2x13x156xf32> to vector<2x13x6xf32>
    %43 = vector.extract_strided_slice %25 {offsets = [0, 0, 42], sizes = [2, 13, 6], strides = [1, 1, 1]} : vector<2x13x156xf32> to vector<2x13x6xf32>
    %44 = vector.extract_strided_slice %25 {offsets = [0, 0, 54], sizes = [2, 13, 6], strides = [1, 1, 1]} : vector<2x13x156xf32> to vector<2x13x6xf32>
    %45 = vector.extract_strided_slice %25 {offsets = [0, 0, 66], sizes = [2, 13, 6], strides = [1, 1, 1]} : vector<2x13x156xf32> to vector<2x13x6xf32>
    %46 = vector.extract_strided_slice %25 {offsets = [0, 0, 78], sizes = [2, 13, 6], strides = [1, 1, 1]} : vector<2x13x156xf32> to vector<2x13x6xf32>
    %47 = vector.extract_strided_slice %25 {offsets = [0, 0, 90], sizes = [2, 13, 6], strides = [1, 1, 1]} : vector<2x13x156xf32> to vector<2x13x6xf32>
    %48 = vector.extract_strided_slice %25 {offsets = [0, 0, 102], sizes = [2, 13, 6], strides = [1, 1, 1]} : vector<2x13x156xf32> to vector<2x13x6xf32>
    %49 = vector.extract_strided_slice %25 {offsets = [0, 0, 114], sizes = [2, 13, 6], strides = [1, 1, 1]} : vector<2x13x156xf32> to vector<2x13x6xf32>
    %50 = vector.extract_strided_slice %25 {offsets = [0, 0, 126], sizes = [2, 13, 6], strides = [1, 1, 1]} : vector<2x13x156xf32> to vector<2x13x6xf32>
    %51 = vector.extract_strided_slice %25 {offsets = [0, 0, 138], sizes = [2, 13, 6], strides = [1, 1, 1]} : vector<2x13x156xf32> to vector<2x13x6xf32>
    %52 = vector.extract_strided_slice %25 {offsets = [0, 0, 150], sizes = [2, 13, 6], strides = [1, 1, 1]} : vector<2x13x156xf32> to vector<2x13x6xf32>
    %53 = tpu.concatenate %40, %41, %42, %43, %44, %45, %46, %47, %48, %49, %50, %51, %52 in 2 : vector<2x13x6xf32>, vector<2x13x6xf32>, vector<2x13x6xf32>, vector<2x13x6xf32>, vector<2x13x6xf32>, vector<2x13x6xf32>, vector<2x13x6xf32>, vector<2x13x6xf32>, vector<2x13x6xf32>, vector<2x13x6xf32>, vector<2x13x6xf32>, vector<2x13x6xf32>, vector<2x13x6xf32> -> vector<2x13x78xf32>
    %54 = arith.maximumf %39, %53 : vector<2x13x78xf32>
    %55 = vector.extract_strided_slice %54 {offsets = [0, 0, 0], sizes = [2, 11, 78], strides = [1, 1, 1]} : vector<2x13x78xf32> to vector<2x11x78xf32>
    %56 = vector.extract_strided_slice %54 {offsets = [0, 1, 0], sizes = [2, 11, 78], strides = [1, 1, 1]} : vector<2x13x78xf32> to vector<2x11x78xf32>
    %57 = vector.extract_strided_slice %54 {offsets = [0, 2, 0], sizes = [2, 11, 78], strides = [1, 1, 1]} : vector<2x13x78xf32> to vector<2x11x78xf32>
    %58 = tpu.concatenate %55, %56, %57 in 2 : vector<2x11x78xf32>, vector<2x11x78xf32>, vector<2x11x78xf32> -> vector<2x11x234xf32>
    %59 = vector.shape_cast %58 : vector<2x11x234xf32> to vector<22x234xf32>
    %c0_11 = arith.constant 0 : index
    %c0_12 = arith.constant 0 : index
    %60 = vector.load %arg6[%c0_11, %c0_12] : memref<234x176xf32, #tpu.memory_space<vmem>>, vector<234x176xf32>
    %cst_13 = arith.constant dense<0.000000e+00> : vector<22x176xf32>
    %61 = tpu.matmul %59, %60, %cst_13 {dimension_numbers = #tpu.dot_dimension_numbers<[1], [0], [0], [1], [0, 0, 1, 1], [], []>} : vector<22x234xf32>, vector<234x176xf32>, vector<22x176xf32> -> vector<22x176xf32>
    %c0_14 = arith.constant 0 : index
    %c0_15 = arith.constant 0 : index
    %62 = vector.load %arg7[%c0_14, %c0_15] : memref<1x176xf32, #tpu.memory_space<vmem>>, vector<1x176xf32>
    %63 = vector.broadcast %62 : vector<1x176xf32> to vector<22x176xf32>
    %64 = arith.addf %61, %63 : vector<22x176xf32>
    %cst_16 = arith.constant 0.000000e+00 : f32
    %65 = vector.broadcast %cst_16 : f32 to vector<22x176xf32>
    %66 = arith.maximumf %64, %65 : vector<22x176xf32>
    %c0_17 = arith.constant 0 : index
    %c0_18 = arith.constant 0 : index
    %67 = vector.load %arg8[%c0_17, %c0_18] : memref<1x176xf32, #tpu.memory_space<vmem>>, vector<1x176xf32>
    %68 = vector.broadcast %67 : vector<1x176xf32> to vector<22x176xf32>
    %69 = arith.mulf %66, %68 : vector<22x176xf32>
    %c0_19 = arith.constant 0 : index
    %c0_20 = arith.constant 0 : index
    %70 = vector.load %arg9[%c0_19, %c0_20] : memref<1x176xf32, #tpu.memory_space<vmem>>, vector<1x176xf32>
    %71 = vector.broadcast %70 : vector<1x176xf32> to vector<22x176xf32>
    %72 = arith.addf %69, %71 : vector<22x176xf32>
    %73 = vector.shape_cast %72 : vector<22x176xf32> to vector<2x11x176xf32>
    %74 = vector.extract_strided_slice %73 {offsets = [0, 0, 0], sizes = [2, 10, 176], strides = [1, 1, 1]} : vector<2x11x176xf32> to vector<2x10x176xf32>
    %75 = vector.shape_cast %74 : vector<2x10x176xf32> to vector<2x5x2x176xf32>
    %76 = vector.extract_strided_slice %75 {offsets = [0, 0, 0, 0], sizes = [2, 5, 1, 176], strides = [1, 1, 1, 1]} : vector<2x5x2x176xf32> to vector<2x5x1x176xf32>
    %77 = vector.shape_cast %76 : vector<2x5x1x176xf32> to vector<2x5x176xf32>
    %78 = vector.extract_strided_slice %75 {offsets = [0, 0, 1, 0], sizes = [2, 5, 1, 176], strides = [1, 1, 1, 1]} : vector<2x5x2x176xf32> to vector<2x5x1x176xf32>
    %79 = vector.shape_cast %78 : vector<2x5x1x176xf32> to vector<2x5x176xf32>
    %80 = arith.maximumf %77, %79 : vector<2x5x176xf32>
    %81 = vector.extract_strided_slice %80 {offsets = [0, 0, 0], sizes = [2, 5, 16], strides = [1, 1, 1]} : vector<2x5x176xf32> to vector<2x5x16xf32>
    %82 = vector.extract_strided_slice %80 {offsets = [0, 0, 32], sizes = [2, 5, 16], strides = [1, 1, 1]} : vector<2x5x176xf32> to vector<2x5x16xf32>
    %83 = vector.extract_strided_slice %80 {offsets = [0, 0, 64], sizes = [2, 5, 16], strides = [1, 1, 1]} : vector<2x5x176xf32> to vector<2x5x16xf32>
    %84 = vector.extract_strided_slice %80 {offsets = [0, 0, 96], sizes = [2, 5, 16], strides = [1, 1, 1]} : vector<2x5x176xf32> to vector<2x5x16xf32>
    %85 = vector.extract_strided_slice %80 {offsets = [0, 0, 128], sizes = [2, 5, 16], strides = [1, 1, 1]} : vector<2x5x176xf32> to vector<2x5x16xf32>
    %86 = tpu.concatenate %81, %82, %83, %84, %85 in 2 : vector<2x5x16xf32>, vector<2x5x16xf32>, vector<2x5x16xf32>, vector<2x5x16xf32>, vector<2x5x16xf32> -> vector<2x5x80xf32>
    %87 = vector.extract_strided_slice %80 {offsets = [0, 0, 16], sizes = [2, 5, 16], strides = [1, 1, 1]} : vector<2x5x176xf32> to vector<2x5x16xf32>
    %88 = vector.extract_strided_slice %80 {offsets = [0, 0, 48], sizes = [2, 5, 16], strides = [1, 1, 1]} : vector<2x5x176xf32> to vector<2x5x16xf32>
    %89 = vector.extract_strided_slice %80 {offsets = [0, 0, 80], sizes = [2, 5, 16], strides = [1, 1, 1]} : vector<2x5x176xf32> to vector<2x5x16xf32>
    %90 = vector.extract_strided_slice %80 {offsets = [0, 0, 112], sizes = [2, 5, 16], strides = [1, 1, 1]} : vector<2x5x176xf32> to vector<2x5x16xf32>
    %91 = vector.extract_strided_slice %80 {offsets = [0, 0, 144], sizes = [2, 5, 16], strides = [1, 1, 1]} : vector<2x5x176xf32> to vector<2x5x16xf32>
    %92 = tpu.concatenate %87, %88, %89, %90, %91 in 2 : vector<2x5x16xf32>, vector<2x5x16xf32>, vector<2x5x16xf32>, vector<2x5x16xf32>, vector<2x5x16xf32> -> vector<2x5x80xf32>
    %93 = arith.maximumf %86, %92 : vector<2x5x80xf32>
    %94 = vector.extract_strided_slice %93 {offsets = [0, 0, 0], sizes = [2, 1, 80], strides = [1, 1, 1]} : vector<2x5x80xf32> to vector<2x1x80xf32>
    %95 = vector.shape_cast %94 : vector<2x1x80xf32> to vector<2x80xf32>
    %96 = vector.extract_strided_slice %93 {offsets = [0, 1, 0], sizes = [2, 1, 80], strides = [1, 1, 1]} : vector<2x5x80xf32> to vector<2x1x80xf32>
    %97 = vector.shape_cast %96 : vector<2x1x80xf32> to vector<2x80xf32>
    %98 = vector.extract_strided_slice %93 {offsets = [0, 2, 0], sizes = [2, 1, 80], strides = [1, 1, 1]} : vector<2x5x80xf32> to vector<2x1x80xf32>
    %99 = vector.shape_cast %98 : vector<2x1x80xf32> to vector<2x80xf32>
    %100 = vector.extract_strided_slice %93 {offsets = [0, 3, 0], sizes = [2, 1, 80], strides = [1, 1, 1]} : vector<2x5x80xf32> to vector<2x1x80xf32>
    %101 = vector.shape_cast %100 : vector<2x1x80xf32> to vector<2x80xf32>
    %102 = vector.extract_strided_slice %93 {offsets = [0, 4, 0], sizes = [2, 1, 80], strides = [1, 1, 1]} : vector<2x5x80xf32> to vector<2x1x80xf32>
    %103 = vector.shape_cast %102 : vector<2x1x80xf32> to vector<2x80xf32>
    %104 = tpu.concatenate %95, %97, %99, %101, %103 in 1 : vector<2x80xf32>, vector<2x80xf32>, vector<2x80xf32>, vector<2x80xf32>, vector<2x80xf32> -> vector<2x400xf32>
    %c0_21 = arith.constant 0 : index
    %c0_22 = arith.constant 0 : index
    %105 = vector.load %arg10[%c0_21, %c0_22] : memref<400x128xf32, #tpu.memory_space<vmem>>, vector<400x128xf32>
    %cst_23 = arith.constant dense<0.000000e+00> : vector<2x128xf32>
    %106 = tpu.matmul %104, %105, %cst_23 {dimension_numbers = #tpu.dot_dimension_numbers<[1], [0], [0], [1], [0, 0, 1, 1], [], []>} : vector<2x400xf32>, vector<400x128xf32>, vector<2x128xf32> -> vector<2x128xf32>
    %c0_24 = arith.constant 0 : index
    %c0_25 = arith.constant 0 : index
    %107 = vector.load %arg11[%c0_24, %c0_25] : memref<1x128xf32, #tpu.memory_space<vmem>>, vector<1x128xf32>
    %108 = vector.broadcast %107 : vector<1x128xf32> to vector<2x128xf32>
    %109 = arith.addf %106, %108 : vector<2x128xf32>
    %cst_26 = arith.constant 0.000000e+00 : f32
    %110 = vector.broadcast %cst_26 : f32 to vector<2x128xf32>
    %111 = arith.maximumf %109, %110 : vector<2x128xf32>
    %c0_27 = arith.constant 0 : index
    %c0_28 = arith.constant 0 : index
    %112 = vector.load %arg12[%c0_27, %c0_28] : memref<128x128xf32, #tpu.memory_space<vmem>>, vector<128x128xf32>
    %cst_29 = arith.constant dense<0.000000e+00> : vector<2x128xf32>
    %113 = tpu.matmul %111, %112, %cst_29 {dimension_numbers = #tpu.dot_dimension_numbers<[1], [0], [0], [1], [0, 0, 1, 1], [], []>} : vector<2x128xf32>, vector<128x128xf32>, vector<2x128xf32> -> vector<2x128xf32>
    %c0_30 = arith.constant 0 : index
    %c0_31 = arith.constant 0 : index
    %114 = vector.load %arg13[%c0_30, %c0_31] : memref<1x128xf32, #tpu.memory_space<vmem>>, vector<1x128xf32>
    %115 = vector.broadcast %114 : vector<1x128xf32> to vector<2x128xf32>
    %116 = arith.addf %113, %115 : vector<2x128xf32>
    %cst_32 = arith.constant dense<0xFF800000> : vector<2xf32>
    %117 = vector.multi_reduction <maximumf>, %116, %cst_32 [1] : vector<2x128xf32> to vector<2xf32>
    %118 = vector.shape_cast %117 : vector<2xf32> to vector<2x1xf32>
    %119 = vector.broadcast %118 : vector<2x1xf32> to vector<2x128xf32>
    %120 = arith.subf %116, %119 : vector<2x128xf32>
    %121 = math.exp %120 : vector<2x128xf32>
    %cst_33 = arith.constant dense<0.000000e+00> : vector<2xf32>
    %122 = vector.multi_reduction <add>, %121, %cst_33 [1] : vector<2x128xf32> to vector<2xf32>
    %123 = vector.shape_cast %122 : vector<2xf32> to vector<2x1xf32>
    %124 = vector.broadcast %123 : vector<2x1xf32> to vector<2x128xf32>
    %125 = arith.divf %121, %124 : vector<2x128xf32>
    %c0_34 = arith.constant 0 : index
    %c0_35 = arith.constant 0 : index
    %126 = vector.load %arg14[%c0_34, %c0_35] : memref<2x128xf32, #tpu.memory_space<vmem>>, vector<2x128xf32>
    tpu.vector_store %arg14[%c0_34, %c0_35], %125 {strides = array<i32>} : memref<2x128xf32, #tpu.memory_space<vmem>>, vector<2x128xf32>,
    return
  }
  func.func @transform_0(%arg0: i32) -> (i32, i32, i32) {
    %c0_i32 = arith.constant 0 : i32
    %c0_i32_0 = arith.constant 0 : i32
    %c0_i32_1 = arith.constant 0 : i32
    return %arg0, %c0_i32, %c0_i32_0 : i32, i32, i32
  }
  func.func @transform_1(%arg0: i32) -> (i32, i32) {
    %c0_i32 = arith.constant 0 : i32
    %c0_i32_0 = arith.constant 0 : i32
    %c0_i32_1 = arith.constant 0 : i32
    return %c0_i32, %c0_i32_0 : i32, i32
  }
  func.func @transform_2(%arg0: i32) -> (i32, i32) {
    %c0_i32 = arith.constant 0 : i32
    %c0_i32_0 = arith.constant 0 : i32
    %c0_i32_1 = arith.constant 0 : i32
    return %c0_i32, %c0_i32_0 : i32, i32
  }
  func.func @transform_3(%arg0: i32) -> (i32, i32) {
    %c0_i32 = arith.constant 0 : i32
    %c0_i32_0 = arith.constant 0 : i32
    %c0_i32_1 = arith.constant 0 : i32
    return %c0_i32, %c0_i32_0 : i32, i32
  }
  func.func @transform_4(%arg0: i32) -> (i32, i32) {
    %c0_i32 = arith.constant 0 : i32
    %c0_i32_0 = arith.constant 0 : i32
    %c0_i32_1 = arith.constant 0 : i32
    return %c0_i32, %c0_i32_0 : i32, i32
  }
  func.func @transform_5(%arg0: i32) -> (i32, i32) {
    %c0_i32 = arith.constant 0 : i32
    %c0_i32_0 = arith.constant 0 : i32
    %c0_i32_1 = arith.constant 0 : i32
    return %c0_i32, %c0_i32_0 : i32, i32
  }
  func.func @transform_6(%arg0: i32) -> (i32, i32) {
    %c0_i32 = arith.constant 0 : i32
    %c0_i32_0 = arith.constant 0 : i32
    %c0_i32_1 = arith.constant 0 : i32
    return %c0_i32, %c0_i32_0 : i32, i32
  }
  func.func @transform_7(%arg0: i32) -> (i32, i32) {
    %c0_i32 = arith.constant 0 : i32
    %c0_i32_0 = arith.constant 0 : i32
    %c0_i32_1 = arith.constant 0 : i32
    return %c0_i32, %c0_i32_0 : i32, i32
  }
  func.func @transform_8(%arg0: i32) -> (i32, i32) {
    %c0_i32 = arith.constant 0 : i32
    %c0_i32_0 = arith.constant 0 : i32
    %c0_i32_1 = arith.constant 0 : i32
    return %c0_i32, %c0_i32_0 : i32, i32
  }
  func.func @transform_9(%arg0: i32) -> (i32, i32) {
    %c0_i32 = arith.constant 0 : i32
    %c0_i32_0 = arith.constant 0 : i32
    %c0_i32_1 = arith.constant 0 : i32
    return %c0_i32, %c0_i32_0 : i32, i32
  }
  func.func @transform_10(%arg0: i32) -> (i32, i32) {
    %c0_i32 = arith.constant 0 : i32
    %c0_i32_0 = arith.constant 0 : i32
    %c0_i32_1 = arith.constant 0 : i32
    return %c0_i32, %c0_i32_0 : i32, i32
  }
  func.func @transform_11(%arg0: i32) -> (i32, i32) {
    %c0_i32 = arith.constant 0 : i32
    %c0_i32_0 = arith.constant 0 : i32
    %c0_i32_1 = arith.constant 0 : i32
    return %c0_i32, %c0_i32_0 : i32, i32
  }
  func.func @transform_12(%arg0: i32) -> (i32, i32) {
    %c0_i32 = arith.constant 0 : i32
    %c0_i32_0 = arith.constant 0 : i32
    %c0_i32_1 = arith.constant 0 : i32
    return %c0_i32, %c0_i32_0 : i32, i32
  }
  func.func @transform_13(%arg0: i32) -> (i32, i32) {
    %c0_i32 = arith.constant 0 : i32
    %c0_i32_0 = arith.constant 0 : i32
    return %arg0, %c0_i32 : i32, i32
  }
}

</mosaic_0001>

<bundles_post_ra>
// kernel: tile.38
= control target key start
LH: loop header
LB: loop body
LE: loop exit
PB: predicated region body
PF: predicated region fallthrough
CT: control target
= control target key end

     0   :  { %s40_s0 = inlined_call_operand.vmem [shape: f32[6], index: 0, kind: input, shape index: {}]   ;;  %s41_s1 = inlined_call_operand.vmem [shape: f32[26,6], index: 1, kind: output, shape index: {}]  }
   0x1   :  { %v4_v0 = vld [vmem:[%s40_s0] ss:$0 sm:$0xff] }
   0x2   :  { %5 = vst [vmem:[%s41_s1] sm:$0xff] %v4_v0  ;;  %12 = vst [vmem:[%s41_s1 + $0x8] sm:$0xff] %v4_v0 }
   0x3   :  { %13 = vst [vmem:[%s41_s1 + $0x10] sm:$0xff] %v4_v0  ;;  %14 = vst [vmem:[%s41_s1 + $0x18] sm:$0xff] %v4_v0 }

// kernel: tile.39
= control target key start
LH: loop header
LB: loop body
LE: loop exit
PB: predicated region body
PF: predicated region fallthrough
CT: control target
= control target key end

     0   :  { %vm9_vm0 = vcmask 15360   ;;  %s229_s12 = smov 126   ;;  %s230_s13 = smov 114   ;;  %vm3_vm1 = vcmask 48128   ;;  %vm13_vm2 = vcmask 31744   ;;  %vm16_vm3 = vcmask 1048560   ;;  %s351_s0 = inlined_call_operand.vmem [shape: f32[26,6], index: 0, kind: input, shape index: {}]   ;;  %s352_s1 = inlined_call_operand.vmem [shape: f32[1,156], index: 1, kind: output, shape index: {}]  }
   0x1   :  { %v177_v0 = vld [vmem:[%s351_s0 + $0x15] sm:$0x1]   ;;  %v180_v3 = vld [vmem:[%s351_s0 + $0x13] sm:$0x1]   ;;  %v179_v4 = vld [vmem:[%s351_s0 + $0x14] sm:$0x1]  }
   0x2   :  { %v178_v1 = vld [vmem:[%s351_s0 + $0x15] sm:$0x1]   ;;  %26 = vrot.lane.b32.xlu1 %v180_v3, %s230_s13  ;;  %v181_v5 = vld [vmem:[%s351_s0 + $0x12] sm:$0x1]   ;;  %s231_s18 = smov 120   ;;  %s232_s19 = smov 108  }
   0x3   :  { %v10_v2 = vsel %vm9_vm0, %v178_v1, %v177_v0  ;;  %v182_v6 = vld [vmem:[%s351_s0 + $0x11] sm:$0x1]   ;;  %v183_v7 = vld [vmem:[%s351_s0 + $0x10] sm:$0x1]   ;;  %s233_s24 = smov 102   ;;  %s234_s25 = smov 96  }
   0x4   :  { %11 = vrot.lane.b32.xlu0 %v10_v2, %s229_s12  ;;  %v184_v8 = vld [vmem:[%s351_s0 + $0xf] sm:$0x1]   ;;  %v185_v9 = vld [vmem:[%s351_s0 + $0xe] sm:$0x1]   ;;  %v2_v10 = vld [vmem:[%s351_s0] sm:$0x1]  }
   0x5   :  { %s235_s3 = smov 90   ;;  %s236_s4 = smov 84   ;;  %4 = vst.msk [vmem:[#allocation0] sm:$0x1] %vm3_vm1, %v2_v10   ;;  %v186_v11 = vld [vmem:[%s351_s0 + $0xd] sm:$0x1]  }
   0x6   :  { %32 = vrot.lane.b32.xlu1 %v181_v5, %s232_s19  ;;  %v187_v12 = vld [vmem:[%s351_s0 + $0xc] sm:$0x1]   ;;  %s237_s9 = smov 78   ;;  %s238_s10 = smov 72   ;;  %v188_v13 = vld [vmem:[%s351_s0 + $0xb] sm:$0x1]  }
   0x7   :  { %v189_v14 = vld [vmem:[%s351_s0 + $0xa] sm:$0x1]   ;;  %s239_s15 = smov 66   ;;  %s240_s16 = smov 60   ;;  %v190_v15 = vld [vmem:[%s351_s0 + $0x9] sm:$0x1]  }
   0x8   :  { %20 = vrot.lane.b32.xlu0 %v179_v4, %s231_s18  ;;  %v191_v16 = vld [vmem:[%s351_s0 + $0x8] sm:$0x1]   ;;  %s241_s21 = smov 54   ;;  %s242_s22 = smov 48   ;;  %v192_v17 = vld [vmem:[%s351_s0 + $0x7] sm:$0x1]  }
   0x9   :  { %v193_v18 = vld [vmem:[%s351_s0 + $0x6] sm:$0x1]   ;;  %s243_s27 = smov 42   ;;  %s244_s28 = smov 36   ;;  %v194_v19 = vld [vmem:[%s351_s0 + $0x5] sm:$0x1]  }
   0xa   :  { %44 = vrot.lane.b32.xlu1 %v183_v7, %s234_s25  ;;  %v195_v20 = vld [vmem:[%s351_s0 + $0x4] sm:$0x1]   ;;  %s246_s5 = smov 24   ;;  %v196_v21 = vld [vmem:[%s351_s0 + $0x19] sm:$0x1]   ;;  %s248_s11 = smov 18  }
   0xb   :  { %v197_v22 = vld [vmem:[%s351_s0 + $0x3] sm:$0x1]   ;;  %v198_v23 = vld [vmem:[%s351_s0 + $0x18] sm:$0x1]   ;;  %v199_v24 = vld [vmem:[%s351_s0 + $0x2] sm:$0x1]  }
   0xc   :  { %38 = vrot.lane.b32.xlu0 %v182_v6, %s233_s24  ;;  %s250_s17 = smov 12   ;;  %v200_v25 = vld [vmem:[%s351_s0 + $0x17] sm:$0x1]   ;;  %v201_v26 = vld [vmem:[%s351_s0 + $0x1] sm:$0x1]   ;;  %s252_s23 = smov 6  }
   0xd   :  { %v202_v27 = vld [vmem:[%s351_s0 + $0x16] sm:$0x1]   ;;  %s253_s0 = smov 4   ;;  %vm22_vm4 = vcmask 1032128   ;;  %vm28_vm5 = vcmask 982928   ;;  %vm34_vm6 = vcmask 933728  }
   0xe   :  { %56 = vrot.lane.b32.xlu1 %v185_v9, %s236_s4  ;;  %s245_s4 = smov 30   ;;  %vm40_vm7 = vcmask 884528   ;;  %vm46_vm8 = vcmask 835328   ;;  %vm52_vm9 = vcmask 786128   ;;  %vm58_vm10 = vcmask 736928  }
   0xf   :  { %vm64_vm11 = vcmask 687728   ;;  %vm70_vm12 = vcmask 638528   ;;  %vm76_vm13 = vcmask 589328   ;;  %vm82_vm14 = vcmask 540128  }
  0x10   :  { %50 = vrot.lane.b32.xlu0 %v184_v8, %s235_s3  ;;  %vm88_vm15 = vcmask 490928   ;;  %vm94_vm0 = vcmask 441728   ;;  %vm100_vm1 = vcmask 392528  }
  0x12   :  { %68 = vrot.lane.b32.xlu1 %v187_v12, %s238_s10  ;;  %s247_s10 = smov 22  }
  0x14   :  { %62 = vrot.lane.b32.xlu0 %v186_v11, %s237_s9 }
  0x16   :  { %80 = vrot.lane.b32.xlu1 %v189_v14, %s240_s16  ;;  %s249_s16 = smov 16  }
  0x18   :  { %74 = vrot.lane.b32.xlu0 %v188_v13, %s239_s15 }
  0x1a   :  { %92 = vrot.lane.b32.xlu1 %v191_v16, %s242_s22  ;;  %s251_s22 = smov 10  }
  0x1c   :  { %86 = vrot.lane.b32.xlu0 %v190_v15, %s241_s21 }
  0x1e   :  { %104 = vrot.lane.b32.xlu1 %v193_v18, %s244_s28 }
  0x20   :  { %98 = vrot.lane.b32.xlu0 %v192_v17, %s243_s27 }
  0x22   :  { %116 = vrot.lane.b32.xlu1 %v195_v20, %s246_s5 }
  0x24   :  { %110 = vrot.lane.b32.xlu0 %v194_v19, %s245_s4 }
  0x26   :  { %129 = vrot.lane.b32.xlu1 %v197_v22, %s248_s11 }
  0x28   :  { %122 = vrot.lane.b32.xlu0 %v196_v21, %s247_s10 }
  0x2a   :  { %142 = vrot.lane.b32.xlu1 %v199_v24, %s250_s17 }
  0x2c   :  { %135 = vrot.lane.b32.xlu0 %v198_v23, %s249_s16 }
  0x2e   :  { %155 = vrot.lane.b32.xlu1 %v201_v26, %s252_s23 }
  0x30   :  { %148 = vrot.lane.b32.xlu0 %v200_v25, %s251_s22 }
  0x34   :  { %161 = vrot.lane.b32.xlu0 %v202_v27, %s253_s0 }
  0x74   :  { %v27_v29 = vpop.permute.xlu1 %26  }
  0x76   :  { %v12_v28 = vpop.permute.xlu0 %11  }
  0x77   :  { %15 = vst.msk [vmem:[#allocation0 + $0x8] sm:$0x1] %vm13_vm2, %v12_v28   ;;  %vm106_vm2 = vcmask 343328  }
  0x78   :  { %17 = vst.msk [vmem:[#allocation0] sm:$0x1] %vm16_vm3, %v12_v28   ;;  %v33_v31 = vpop.permute.xlu1 %32   ;;  %vm112_vm3 = vcmask 294128  }
  0x7a   :  { %v21_v30 = vpop.permute.xlu0 %20  }
  0x7b   :  { %23 = vst.msk [vmem:[#allocation0] sm:$0x1] %vm22_vm4, %v21_v30   ;;  %vm118_vm4 = vcmask 244928  }
  0x7c   :  { %29 = vst.msk [vmem:[#allocation0] sm:$0x1] %vm28_vm5, %v27_v29   ;;  %v45_v33 = vpop.permute.xlu1 %44   ;;  %vm124_vm5 = vcmask 228528  }
  0x7d   :  { %35 = vst.msk [vmem:[#allocation0] sm:$0x1] %vm34_vm6, %v33_v31   ;;  %vm131_vm6 = vcmask 195728  }
  0x7e   :  { %v39_v32 = vpop.permute.xlu0 %38  }
  0x7f   :  { %41 = vst.msk [vmem:[#allocation0] sm:$0x1] %vm40_vm7, %v39_v32   ;;  %vm137_vm7 = vcmask 179328  }
  0x80   :  { %47 = vst.msk [vmem:[#allocation0] sm:$0x1] %vm46_vm8, %v45_v33   ;;  %v57_v35 = vpop.permute.xlu1 %56   ;;  %vm144_vm8 = vcmask 146528  }
  0x82   :  { %v51_v34 = vpop.permute.xlu0 %50  }
  0x83   :  { %53 = vst.msk [vmem:[#allocation0] sm:$0x1] %vm52_vm9, %v51_v34   ;;  %vm150_vm9 = vcmask 130128  }
  0x84   :  { %59 = vst.msk [vmem:[#allocation0] sm:$0x1] %vm58_vm10, %v57_v35   ;;  %v69_v37 = vpop.permute.xlu1 %68   ;;  %vm157_vm10 = vcmask 97328  }
  0x86   :  { %v63_v36 = vpop.permute.xlu0 %62  }
  0x87   :  { %65 = vst.msk [vmem:[#allocation0] sm:$0x1] %vm64_vm11, %v63_v36   ;;  %vm163_vm11 = vcmask 80928  }
  0x88   :  { %71 = vst.msk [vmem:[#allocation0] sm:$0x1] %vm70_vm12, %v69_v37   ;;  %v81_v39 = vpop.permute.xlu1 %80  }
  0x8a   :  { %v75_v38 = vpop.permute.xlu0 %74  }
  0x8b   :  { %77 = vst.msk [vmem:[#allocation0] sm:$0x1] %vm76_vm13, %v75_v38  }
  0x8c   :  { %83 = vst.msk [vmem:[#allocation0] sm:$0x1] %vm82_vm14, %v81_v39   ;;  %v93_v41 = vpop.permute.xlu1 %92  }
  0x8e   :  { %v87_v40 = vpop.permute.xlu0 %86  }
  0x8f   :  { %89 = vst.msk [vmem:[#allocation0] sm:$0x1] %vm88_vm15, %v87_v40  }
  0x90   :  { %95 = vst.msk [vmem:[#allocation0] sm:$0x1] %vm94_vm0, %v93_v41   ;;  %v105_v43 = vpop.permute.xlu1 %104  }
  0x92   :  { %v99_v42 = vpop.permute.xlu0 %98  }
  0x93   :  { %101 = vst.msk [vmem:[#allocation0] sm:$0x1] %vm100_vm1, %v99_v42  }
  0x94   :  { %107 = vst.msk [vmem:[#allocation0] sm:$0x1] %vm106_vm2, %v105_v43   ;;  %v117_v45 = vpop.permute.xlu1 %116  }
  0x96   :  { %v111_v44 = vpop.permute.xlu0 %110  }
  0x97   :  { %113 = vst.msk [vmem:[#allocation0] sm:$0x1] %vm112_vm3, %v111_v44  }
  0x98   :  { %119 = vst.msk [vmem:[#allocation0] sm:$0x1] %vm118_vm4, %v117_v45   ;;  %v130_v47 = vpop.permute.xlu1 %129  }
  0x99   :  { %132 = vst.msk [vmem:[#allocation0] sm:$0x1] %vm131_vm6, %v130_v47  }
  0x9a   :  { %v123_v46 = vpop.permute.xlu0 %122  }
  0x9b   :  { %126 = vst.msk [vmem:[#allocation0 + $0x8] sm:$0x1] %vm124_vm5, %v123_v46  }
  0x9c   :  { %v143_v49 = vpop.permute.xlu1 %142  }
  0x9d   :  { %145 = vst.msk [vmem:[#allocation0] sm:$0x1] %vm144_vm8, %v143_v49  }
  0x9e   :  { %v136_v48 = vpop.permute.xlu0 %135  }
  0x9f   :  { %139 = vst.msk [vmem:[#allocation0 + $0x8] sm:$0x1] %vm137_vm7, %v136_v48  }
  0xa0   :  { %v156_v51 = vpop.permute.xlu1 %155  }
  0xa1   :  { %158 = vst.msk [vmem:[#allocation0] sm:$0x1] %vm157_vm10, %v156_v51  }
  0xa2   :  { %v149_v50 = vpop.permute.xlu0 %148  }
  0xa3   :  { %152 = vst.msk [vmem:[#allocation0 + $0x8] sm:$0x1] %vm150_vm9, %v149_v50  }
  0xa6   :  { %v162_v52 = vpop.permute.xlu0 %161  }
  0xa7   :  { %165 = vst.msk [vmem:[#allocation0 + $0x8] sm:$0x1] %vm163_vm11, %v162_v52  }
  0xa8   :  { %v169_v53 = vld [vmem:[#allocation0] sm:$0x1] }
  0xa9   :  { %171 = vst [vmem:[%s352_s1] sm:$0x1] %v169_v53 }
  0xae   :  { %v173_v54 = vld [vmem:[#allocation0 + $0x8] sm:$0x1] }
  0xaf   :  { %203 = vst [vmem:[%s352_s1 + $0x1] sm:$0x1] %v173_v54 }

// kernel: tile.53
= control target key start
LH: loop header
LB: loop body
LE: loop exit
PB: predicated region body
PF: predicated region fallthrough
CT: control target
= control target key end

     0   :  { %s28_s0 = inlined_call_operand.vmem [shape: f32[16], index: 0, kind: input, shape index: {}]   ;;  %s29_s1 = inlined_call_operand.vmem [shape: f32[11,16], index: 1, kind: output, shape index: {}]  }
   0x1   :  { %v4_v0 = vld [vmem:[%s28_s0] ss:$0 sm:$0xff] }
   0x2   :  { %5 = vst [vmem:[%s29_s1] sm:$0xff] %v4_v0  ;;  %8 = vst [vmem:[%s29_s1 + $0x8] sm:$0xff] %v4_v0 }

// kernel: tile.54
= control target key start
LH: loop header
LB: loop body
LE: loop exit
PB: predicated region body
PF: predicated region fallthrough
CT: control target
= control target key end

     0   :  { %s76_s10 = smov 112   ;;  %s77_s11 = smov 80   ;;  %vm4_vm0 = vcmask 130048   ;;  %vm10_vm1 = vcmask 1048448   ;;  %vm16_vm2 = vcmask 917248   ;;  %vm22_vm3 = vcmask 786048   ;;  %s123_s0 = inlined_call_operand.vmem [shape: f32[11,16], index: 0, kind: input, shape index: {}]   ;;  %s124_s1 = inlined_call_operand.vmem [shape: f32[1,176], index: 1, kind: output, shape index: {}]  }
   0x1   :  { %v61_v0 = vld [vmem:[%s123_s0 + $0x7] sm:$0x1]   ;;  %v63_v1 = vld [vmem:[%s123_s0 + $0x5] sm:$0x1]   ;;  %v62_v2 = vld [vmem:[%s123_s0 + $0x6] sm:$0x1]  }
   0x2   :  { %8 = vrot.lane.b32.xlu0 %v61_v0, %s76_s10  ;;  %20 = vrot.lane.b32.xlu1 %v63_v1, %s77_s11  ;;  %v64_v3 = vld [vmem:[%s123_s0 + $0x4] sm:$0x1]   ;;  %s37_s16 = smov 3  ;;  %s2_s17 = smov 3  ;;  %v65_v5 = vld [vmem:[%s123_s0 + $0x3] sm:$0x1]  }
   0x3   :  { %s78_s18 = smov 96   ;;  %s79_s19 = smov 64   ;;  %v3_v4 = vld [vmem:[%s123_s0] ss:$8 sm:%s2_s17]   ;;  %v66_v6 = vld [vmem:[%s123_s0 + $0x2] ss:$8 sm:%s37_s16]  }
   0x4   :  { %5 = vst.msk [vmem:[#allocation0] ss:$8 sm:$0x3] %vm4_vm0, %v3_v4   ;;  %s44_s26 = smov 3  ;;  %s80_s27 = smov 48   ;;  %vm28_vm4 = vcmask 654848  }
   0x5   :  { %s81_s28 = smov 32   ;;  %v67_v7 = vld [vmem:[%s123_s0 + $0x1] ss:$8 sm:%s44_s26]   ;;  %s82_s0 = smov 16   ;;  %vm34_vm5 = vcmask 523648   ;;  %vm41_vm6 = vcmask 392448  }
   0x6   :  { %14 = vrot.lane.b32.xlu0 %v62_v2, %s78_s18  ;;  %26 = vrot.lane.b32.xlu1 %v64_v3, %s79_s19  ;;  %vm48_vm7 = vcmask 261248  }
   0xa   :  { %32 = vrot.lane.b32.xlu0 %v65_v5, %s80_s27  ;;  %39 = vrot.lane.b32.xlu1 %v66_v6, %s81_s28 }
   0xe   :  { %46 = vrot.lane.b32.xlu0 %v67_v7, %s82_s0 }
  0x74   :  { %v9_v8 = vpop.permute.xlu0 %8   ;;  %v21_v9 = vpop.permute.xlu1 %20  }
  0x75   :  { %11 = vst.msk [vmem:[#allocation0] sm:$0x1] %vm10_vm1, %v9_v8  }
  0x78   :  { %v15_v10 = vpop.permute.xlu0 %14   ;;  %v27_v11 = vpop.permute.xlu1 %26  }
  0x79   :  { %17 = vst.msk [vmem:[#allocation0] sm:$0x1] %vm16_vm2, %v15_v10  }
  0x7a   :  { %23 = vst.msk [vmem:[#allocation0] sm:$0x1] %vm22_vm3, %v21_v9  }
  0x7b   :  { %29 = vst.msk [vmem:[#allocation0] sm:$0x1] %vm28_vm4, %v27_v11  }
  0x7c   :  { %v33_v12 = vpop.permute.xlu0 %32   ;;  %v40_v13 = vpop.permute.xlu1 %39  }
  0x7d   :  { %35 = vst.msk [vmem:[#allocation0] sm:$0x1] %vm34_vm5, %v33_v12  }
  0x7e   :  { %42 = vst.msk [vmem:[#allocation0] ss:$8 sm:$0x3] %vm41_vm6, %v40_v13  }
  0x80   :  { %v47_v14 = vpop.permute.xlu0 %46  }
  0x81   :  { %49 = vst.msk [vmem:[#allocation0] ss:$8 sm:$0x3] %vm48_vm7, %v47_v14  }
  0x88   :  { %v53_v15 = vld [vmem:[#allocation0] sm:$0x1]  ;;  %v57_v16 = vld [vmem:[#allocation0 + $0x8] sm:$0x1] }
  0x89   :  { %55 = vst [vmem:[%s124_s1] sm:$0x1] %v53_v15  ;;  %68 = vst [vmem:[%s124_s1 + $0x1] sm:$0x1] %v57_v16 }

// kernel: mnist_forward.1
= control target key start
LH: loop header
LB: loop body
LE: loop exit
PB: predicated region body
PF: predicated region fallthrough
CT: control target
= control target key end

     0   :  { %vm4684_vm0 = vcmask 1046528   ;;  %vm4685_vm1 = vcmask 1045504   ;;  %s3124_s18 = smov 28   ;;  %s3125_s21 = smov 56   ;;  %s4668_s0 = inlined_call_operand.vmem [shape: f32[2,28,28], index: 0, kind: input, shape index: {}]   ;;  %s4669_s1 = inlined_call_operand.vmem [shape: f32[84,156], index: 1, kind: input, shape index: {}]   ;;  %s4670_s2 = inlined_call_operand.vmem [shape: f32[1,156], index: 2, kind: input, shape index: {}]   ;;  %s4671_s3 = inlined_call_operand.vmem [shape: f32[1,156], index: 3, kind: input, shape index: {}]   ;;  %s4672_s4 = inlined_call_operand.vmem [shape: f32[1,156], index: 4, kind: input, shape index: {}]   ;;  %s4673_s5 = inlined_call_operand.vmem [shape: f32[234,176], index: 5, kind: input, shape index: {}]   ;;  %s4674_s6 = inlined_call_operand.vmem [shape: f32[1,176], index: 6, kind: input, shape index: {}]   ;;  %s4675_s7 = inlined_call_operand.vmem [shape: f32[1,176], index: 7, kind: input, shape index: {}]   ;;  %s4676_s8 = inlined_call_operand.vmem [shape: f32[1,176], index: 8, kind: input, shape index: {}]   ;;  %s4677_s9 = inlined_call_operand.vmem [shape: f32[400,128], index: 9, kind: input, shape index: {}]   ;;  %s4678_s10 = inlined_call_operand.vmem [shape: f32[1,128], index: 10, kind: input, shape index: {}]   ;;  %s4679_s11 = inlined_call_operand.vmem [shape: f32[128,128], index: 11, kind: input, shape index: {}]   ;;  %s4680_s12 = inlined_call_operand.vmem [shape: f32[1,128], index: 12, kind: input, shape index: {}]   ;;  %s4681_s13 = inlined_call_operand.hbm [shape: f32[2,128], index: 13, kind: output, shape index: {}]  }
   0x1   :  { %v3224_v0 = vld [vmem:[%s4668_s0 + $0x8] sm:$0xff]  ;;  %v3229_v1 = vld [vmem:[%s4668_s0 + $0x10] sm:$0xff]  ;;  %v3234_v2 = vld [vmem:[%s4668_s0] sm:$0xff] }
   0x2   :  { %v63_v3 = vrot.slane %v3224_v0, 1  ;;  %v65_v4 = vrot.slane %v3229_v1, 1  ;;  %v62_v5 = vrot.slane %v3234_v2, 1  ;;  %v102_v6 = vrot.slane %v3224_v0, 2  ;;  %v3245_v9 = vld [vmem:[%s4668_s0 + $0x18] sm:$0xf] }
   0x3   :  { %v104_v7 = vrot.slane %v3229_v1, 2  ;;  %v101_v8 = vrot.slane %v3234_v2, 2  ;;  %v282_v12 = vld [vmem:[%s4669_s1 + $0x8] sm:$0xff]  ;;  %v284_v13 = vld [vmem:[%s4669_s1 + $0x18] sm:$0xff]  ;;  %v281_v14 = vld [vmem:[%s4669_s1] sm:$0xff]  ;;  %v67_v17 = vrot.slane %v3245_v9, 1 }
   0x4   :  { %v66_v10 = vsel %vm4684_vm0, %v63_v3, %v65_v4  ;;  %v64_v11 = vsel %vm4684_vm0, %v62_v5, %v63_v3  ;;  %v106_v18 = vrot.slane %v3245_v9, 2  ;;  %v3267_v19 = vld [vmem:[%s4668_s0 + $0x20] sm:$0xff]  ;;  %v3272_v20 = vld [vmem:[%s4668_s0 + $0x28] sm:$0xff]  ;;  %v283_v21 = vld [vmem:[%s4669_s1 + $0x10] sm:$0xff]  ;;  %v2904_v24 = vpack.c.bf16 %v284_v13, %v282_v12 }
   0x5   :  { %78 = vrot.lane.b32.xlu1 %v66_v10, %s3124_s18  ;;  %76 = vrot.lane.b32.xlu0 %v64_v11, %s3124_s18  ;;  %v105_v15 = vsel %vm4685_vm1, %v102_v6, %v104_v7  ;;  %v103_v16 = vsel %vm4685_vm1, %v101_v8, %v102_v6  ;;  %v286_v22 = vld [vmem:[%s4669_s1 + $0x28] sm:$0xff]  ;;  %v288_v23 = vld [vmem:[%s4669_s1 + $0x38] sm:$0xff]  ;;  %v2906_v25 = vpack.c.bf16 %v283_v21, %v281_v14  ;;  %v69_v28 = vrot.slane %v3267_v19, 1 }
   0x6   :  { %v285_v26 = vld [vmem:[%s4669_s1 + $0x20] sm:$0xff]  ;;  %v287_v27 = vld [vmem:[%s4669_s1 + $0x30] sm:$0xff]  ;;  %v70_v29 = vrot.slane %v3272_v20, 1  ;;  %v108_v30 = vrot.slane %v3267_v19, 2  ;;  %v290_v31 = vld [vmem:[%s4669_s1 + $0x48] sm:$0xff]  ;;  %v68_v33 = vsel %vm4684_vm0, %v65_v4, %v67_v17  ;;  %v107_v34 = vsel %vm4685_vm1, %v104_v7, %v106_v18  ;;  %2905 = vmatprep.subr.bf16.mxu0 %v2904_v24 }
   0x7   :  { %v292_v32 = vld [vmem:[%s4669_s1 + $0x58] sm:$0xff]  ;;  %v109_v35 = vrot.slane %v3272_v20, 2  ;;  %v2908_v36 = vpack.c.bf16 %v288_v23, %v286_v22  ;;  %2907 = vmatpush1.bf16.msra.mxu0 %v2906_v25  ;;  %v2910_v37 = vpack.c.bf16 %v287_v27, %v285_v26  ;;  %v289_v39 = vld [vmem:[%s4669_s1 + $0x40] sm:$0xff]  ;;  %v291_v40 = vld [vmem:[%s4669_s1 + $0x50] sm:$0xff] }
   0x8   :  { %v2912_v38 = vpack.c.bf16 %v292_v32, %v290_v31 }
   0x9   :  { %117 = vrot.lane.b32.xlu1 %v105_v15, %s3125_s21  ;;  %115 = vrot.lane.b32.xlu0 %v103_v16, %s3125_s21 }
   0xa   :  { %2909 = vmatprep.subr.bf16.mxu0 %v2908_v36 }
   0xb   :  { %18 = vsyncpa [#allocation3], 0  ;;  %v294_v41 = vld [vmem:[%s4669_s1 + $0x68] sm:$0xff]  ;;  %v296_v42 = vld [vmem:[%s4669_s1 + $0x78] sm:$0xff]  ;;  %v71_v43 = vsel %vm4684_vm0, %v69_v28, %v70_v29  ;;  %v110_v44 = vsel %vm4685_vm1, %v108_v30, %v109_v35  ;;  %v3126_v45 = vmov 0.0   ;;  %2911 = vmatpush1.bf16.msra.mxu0 %v2910_v37  ;;  %v2914_v47 = vpack.c.bf16 %v291_v40, %v289_v39  ;;  %s3131_s28 = smov 104  }
   0xc   :  { %511 = vmatprep.mubr.f32.mxu0 %v3126_v45  ;;  %v3323_v46 = vld [vmem:[%s4668_s0 + $0x30] sm:$0xff]  ;;  %2913 = vmatprep.subr.bf16.mxu0 %v2912_v38  ;;  %v2916_v48 = vpack.c.bf16 %v296_v42, %v294_v41  ;;  %v293_v49 = vld [vmem:[%s4669_s1 + $0x60] sm:$0xff]  ;;  %v298_v51 = vld [vmem:[%s4669_s1 + $0x88] sm:$0xff]  ;;  %vm440_vm2 = vcmask 1043456   ;;  %v3127_v8 = vmov 1983009808   ;;  %v169_v11 = vlaneseq }
   0xd   :  { %80 = vrot.lane.b32.xlu0 %v68_v33, %s3124_s18  ;;  %119 = vrot.lane.b32.xlu1 %v107_v34, %s3125_s21  ;;  %v295_v50 = vld [vmem:[%s4669_s1 + $0x70] sm:$0xff]  ;;  %v300_v52 = vld [vmem:[%s4669_s1 + $0x98] sm:$0xff]  ;;  %v72_v53 = vrot.slane %v3323_v46, 1  ;;  %v111_v54 = vrot.slane %v3323_v46, 2  ;;  %v167_v10 = vunpack.c.l.s4 %v3127_v8  ;;  %vm4683_vm3 = vcmask 228352   ;;  %s3132_s29 = smov 98  }
   0xe   :  { %v3344_v55 = vld [vmem:[%s4668_s0 + $0x38] sm:$0xf]  ;;  %v2918_v56 = vpack.c.bf16 %v295_v50, %v293_v49  ;;  %v2920_v57 = vpack.c.bf16 %v300_v52, %v298_v51  ;;  %v297_v58 = vld [vmem:[%s4669_s1 + $0x80] sm:$0xff]  ;;  %v299_v59 = vld [vmem:[%s4669_s1 + $0x90] sm:$0xff]  ;;  %v3372_v13 = vshrl.u32 %v169_v11, 7  ;;  %vm148_vm4 = vcmask 457728  }
   0xf   :  { %2915 = vmatpush1.bf16.msra.mxu0 %v2914_v47  ;;  %v73_v60 = vsel %vm4684_vm0, %v70_v29, %v72_v53  ;;  %v112_v61 = vsel %vm4685_vm1, %v109_v35, %v111_v54  ;;  %v74_v62 = vrot.slane %v3344_v55, 1  ;;  %v113_v63 = vrot.slane %v3344_v55, 2  ;;  %v302_v4 = vld [vmem:[%s4669_s1 + $0xa8] sm:$0xf]  ;;  %v301_v7 = vld [vmem:[%s4669_s1 + $0xa0] sm:$0xf] }
  0x10   :  { %2917 = vmatprep.subr.bf16.mxu0 %v2916_v48  ;;  %v2922_v3 = vpack.c.bf16 %v299_v59, %v297_v58  ;;  %v168_v12 = vunpack.c.0.s8 %v167_v10  ;;  %vm425_vm5 = vcmask 687104   ;;  %vm4682_vm6 = vcmask 1041409   ;;  %s3133_s30 = smov 92   ;;  %s3134_s14 = smov 86  }
  0x11   :  { %84 = vrot.lane.b32.xlu0 %v71_v43, %s3124_s18  ;;  %123 = vrot.lane.b32.xlu1 %v110_v44, %s3125_s21  ;;  %v75_v5 = vsel %vm4684_vm0, %v72_v53, %v74_v62  ;;  %v114_v6 = vsel %vm4685_vm1, %v111_v54, %v113_v63  ;;  %vm1013_vm7 = vcmask 1042434   ;;  %vm1015_vm8 = vcmask 1043459   ;;  %s3135_s15 = smov 80   ;;  %s3136_s16 = smov 74  }
  0x12   :  { %vm1017_vm9 = vcmask 1044484   ;;  %vm1019_vm10 = vcmask 1045509   ;;  %vm1021_vm11 = vcmask 1046534   ;;  %vm1023_vm12 = vcmask 1047559   ;;  %s3137_s17 = smov 68   ;;  %s3138_s0 = smov 62  }
  0x13   :  { %2919 = vmatpush1.bf16.msra.mxu0 %v2918_v56  ;;  %s3139_s19 = smov 50   ;;  %vm1314_vm13 = vcmask 48128   ;;  %vm1319_vm14 = vcmask 97280   ;;  %vm1324_vm15 = vcmask 146432   ;;  %s3140_s20 = smov 78  }
  0x14   :  { %2921 = vmatprep.subr.bf16.mxu0 %v2920_v57  ;;  %s3146_s25 = smov 48   ;;  %s3148_s1 = smov 32  }
  0x15   :  { %82 = vrot.lane.b32.xlu0 %v67_v17, %s3124_s18  ;;  %121 = vrot.lane.b32.xlu1 %v106_v18, %s3125_s21  ;;  %v3377_v17 = vsub.s32 %v168_v12, %v3372_v13 }
  0x17   :  { %2923 = vmatpush1.bf16.msra.mxu0 %v2922_v3 }
  0x18   :  { %2772 = vmatprep.subr.msk.mxu0 %vm440_vm2, %v302_v4 }
  0x19   :  { %86 = vrot.lane.b32.xlu0 %v73_v60, %s3124_s18  ;;  %125 = vrot.lane.b32.xlu1 %v112_v61, %s3125_s21 }
  0x1b   :  { %2773 = vmatpush1.msk.msra.mxu0 %vm440_vm2, %v301_v7  ;;  %vm1329_vm2 = vcmask 195584  }
  0x1d   :  { %88 = vrot.lane.b32.xlu0 %v75_v5, %s3124_s18  ;;  %127 = vrot.lane.b32.xlu1 %v114_v6, %s3125_s21 }
  0x21   :  { %90 = vrot.lane.b32.xlu0 %v74_v62, %s3124_s18  ;;  %129 = vrot.lane.b32.xlu1 %v113_v63, %s3125_s21 }
  0x77   :  { %v79_v14 = vpop.permute.xlu1 %78  ;;  %v77_v15 = vpop.permute.xlu0 %76 }
  0x78   :  { %v141_v16 = vsel %vm4683_vm3, %v3224_v0, %v79_v14  ;;  %v140_v18 = vsel %vm4683_vm3, %v3234_v2, %v77_v15 }
  0x7b   :  { %v118_v21 = vpop.permute.xlu1 %117  ;;  %v116_v22 = vpop.permute.xlu0 %115 }
  0x7c   :  { %v150_v23 = vsel %vm148_vm4, %v141_v16, %v118_v21  ;;  %v149_v24 = vsel %vm148_vm4, %v140_v18, %v116_v22 }
  0x7d   :  { %v182_v25 = vcombine.high %v150_v23, %v150_v23  ;;  %v189_v26 = vrot.slane %v150_v23, %v3377_v17  ;;  %v165_v27 = vcombine.high %v149_v24, %v149_v24  ;;  %v172_v28 = vrot.slane %v149_v24, %v3377_v17 }
  0x7f   :  { %v196_v0 = vrot.slane %v182_v25, %v3377_v17  ;;  %v179_v29 = vrot.slane %v165_v27, %v3377_v17  ;;  %v180_v30 = vcombine.high %v172_v28, %v172_v28  ;;  %v81_v31 = vpop.permute.xlu0 %80  ;;  %v120_v32 = vpop.permute.xlu1 %119  ;;  %v197_v33 = vcombine.high %v189_v26, %v189_v26 }
  0x80   :  { %v142_v2 = vsel %vm4683_vm3, %v3229_v1, %v81_v31 }
  0x81   :  { %v198_v34 = vcombine.high %v196_v0, %v196_v0  ;;  %v181_v35 = vcombine.high %v179_v29, %v179_v29  ;;  %v315_v36 = vcombine.low %v172_v28, %v180_v30  ;;  %v151_v37 = vsel %vm148_vm4, %v142_v2, %v120_v32 }
  0x82   :  { %v199_v42 = vcombine.high %v151_v37, %v151_v37  ;;  %v206_v43 = vrot.slane %v151_v37, %v3377_v17  ;;  %v332_v47 = vcombine.low %v189_v26, %v197_v33 }
  0x83   :  { %v333_v38 = vcombine.low %v196_v0, %v198_v34  ;;  %v316_v39 = vcombine.low %v179_v29, %v181_v35  ;;  %v85_v40 = vpop.permute.xlu0 %84  ;;  %v124_v41 = vpop.permute.xlu1 %123  ;;  %v323_v1 = vrot.slane %v315_v36, %v3377_v17 }
  0x84   :  { %v144_v44 = vsel %vm4683_vm3, %v3267_v19, %v85_v40  ;;  %v213_v50 = vrot.slane %v199_v42, %v3377_v17  ;;  %v214_v51 = vcombine.high %v206_v43, %v206_v43  ;;  %v340_v62 = vrot.slane %v332_v47, %v3377_v17 }
  0x85   :  { %v330_v48 = vrot.slane %v316_v39, %v3377_v17  ;;  %v153_v49 = vsel %vm148_vm4, %v144_v44, %v124_v41  ;;  %v347_v54 = vrot.slane %v333_v38, %v3377_v17 }
  0x86   :  { %v223_v52 = vcombine.high %v153_v49, %v153_v49  ;;  %v230_v53 = vrot.slane %v153_v49, %v3377_v17  ;;  %v215_v19 = vcombine.high %v213_v50, %v213_v50  ;;  %v349_v59 = vcombine.low %v206_v43, %v214_v51 }
  0x87   :  { %v83_v56 = vpop.permute.xlu0 %82  ;;  %v122_v57 = vpop.permute.xlu1 %121  ;;  %v331_v58 = vcombine.low %v323_v1, %v330_v48  ;;  %v348_v11 = vcombine.low %v340_v62, %v347_v54  ;;  %v3442_v51 = vsub.s32 0, %v3372_v13 }
  0x88   :  { %v237_v60 = vrot.slane %v223_v52, %v3377_v17  ;;  %v238_v61 = vcombine.high %v230_v53, %v230_v53  ;;  %v143_v63 = vsel %vm4683_vm3, %v3245_v9, %v83_v56  ;;  %v350_v3 = vcombine.low %v213_v50, %v215_v19  ;;  %v303_v52 = vld [vmem:[%s4670_s2] sm:$0x3]  ;;  %s3128_s2 = smov 122  }
  0x89   :  { %2774 = vmatmul.mubr.msk.f32.vlgmr.msra.gmra.mrb[0].mxu0 %vm425_vm5, %v331_v58  ;;  %v152_v4 = vsel %vm148_vm4, %v143_v63, %v122_v57  ;;  %v357_v5 = vrot.slane %v349_v59, %v3377_v17  ;;  %v3451_v54 = vrot.slane %v303_v52, %v3442_v51  ;;  %v568_v56 = vld [vmem:[%s4671_s3] sm:$0x3]  ;;  %s3129_s3 = smov 116  }
  0x8a   :  { %517 = vmatprep.mubr.f32.mxu0 %v3126_v45  ;;  %v367_v6 = vcombine.low %v238_v61, %v237_v60  ;;  %v222_v7 = vrot.slane %v152_v4, %v3377_v17  ;;  %v364_v12 = vrot.slane %v350_v3, %v3377_v17  ;;  %v239_v14 = vcombine.high %v237_v60, %v237_v60  ;;  %v594_v19 = vld [vmem:[%s4672_s4] sm:$0x3]  ;;  %s3130_s4 = smov 110  }
  0x8b   :  { %v87_v8 = vpop.permute.xlu0 %86  ;;  %v126_v10 = vpop.permute.xlu1 %125  ;;  %v3464_v60 = vrot.slane %v568_v56, %v3442_v51  ;;  %v3471_v4 = vrot.slane %v594_v19, %v3442_v51 }
  0x8c   :  { %v145_v9 = vsel %vm4683_vm3, %v3272_v20, %v87_v8  ;;  %v366_v15 = vcombine.low %v222_v7, %v230_v53  ;;  %v381_v22 = vrot.slane %v367_v6, %v3377_v17  ;;  %v365_v24 = vcombine.low %v357_v5, %v364_v12 }
  0x8d   :  { %v154_v16 = vsel %vm148_vm4, %v145_v9, %v126_v10  ;;  %2775 = vmatmul.mubr.msk.f32.gmra.mrb[2].mxu0 %vm425_vm5, %v348_v11  ;;  %v3448_v53 = vsub.s32 1, %v3372_v13 }
  0x8e   :  { %v240_v18 = vcombine.high %v154_v16, %v154_v16  ;;  %v247_v21 = vrot.slane %v154_v16, %v3377_v17  ;;  %523 = vmatprep.mubr.f32.mxu0 %v3126_v45  ;;  %v374_v23 = vrot.slane %v366_v15, %v3377_v17 }
  0x8f   :  { %v89_v25 = vpop.permute.xlu0 %88  ;;  %v128_v26 = vpop.permute.xlu1 %127  ;;  %v3457_v57 = vrot.slane %v303_v52, %v3448_v53  ;;  %v3468_v63 = vrot.slane %v568_v56, %v3448_v53  ;;  %v3474_v6 = vrot.slane %v594_v19, %v3448_v53 }
  0x90   :  { %v254_v20 = vrot.slane %v240_v18, %v3377_v17  ;;  %v255_v27 = vcombine.high %v247_v21, %v247_v21  ;;  %v383_v28 = vcombine.low %v239_v14, %v247_v21  ;;  %v146_v0 = vsel %vm4683_vm3, %v3323_v46, %v89_v25 }
  0x91   :  { %2776 = vmatmul.mubr.msk.f32.gmra.mrb[4].mxu0 %vm425_vm5, %v365_v24  ;;  %v155_v29 = vsel %vm148_vm4, %v146_v0, %v128_v26  ;;  %v382_v33 = vcombine.low %v374_v23, %v381_v22 }
  0x92   :  { %v384_v30 = vcombine.low %v255_v27, %v254_v20  ;;  %v256_v31 = vcombine.high %v254_v20, %v254_v20  ;;  %v257_v32 = vcombine.high %v155_v29, %v155_v29  ;;  %529 = vmatprep.mubr.f32.mxu0 %v3126_v45  ;;  %v264_v2 = vrot.slane %v155_v29, %v3377_v17 }
  0x93   :  { %v91_v34 = vpop.permute.xlu0 %90  ;;  %v130_v35 = vpop.permute.xlu1 %129  ;;  %v391_v36 = vrot.slane %v383_v28, %v3377_v17  ;;  %v3487_v28 = vsub.s32 2, %v3372_v13 }
  0x94   :  { %v398_v37 = vrot.slane %v384_v30, %v3377_v17  ;;  %v271_v46 = vrot.slane %v257_v32, %v3377_v17  ;;  %v147_v38 = vsel %vm4683_vm3, %v3344_v55, %v91_v34  ;;  %v272_v39 = vcombine.high %v264_v2, %v264_v2 }
  0x95   :  { %v400_v40 = vcombine.low %v256_v31, %v264_v2  ;;  %2777 = vmatmul.mubr.msk.f32.gmra.mrb[6].mxu0 %vm425_vm5, %v382_v33  ;;  %v156_v41 = vsel %vm148_vm4, %v147_v38, %v130_v35  ;;  %vm1334_vm4 = vcmask 244736   ;;  %vm1931_vm3 = vcmask 1041408  }
  0x96   :  { %535 = vmatprep.mubr.f32.mxu0 %v3126_v45  ;;  %v399_v42 = vcombine.low %v391_v36, %v398_v37  ;;  %v273_v43 = vcombine.high %v271_v46, %v271_v46  ;;  %v280_v44 = vrot.slane %v156_v41, %v3377_v17  ;;  %v401_v47 = vcombine.low %v272_v39, %v271_v46 }
  0x97   :  { %v408_v1 = vrot.slane %v400_v40, %v3377_v17 }
  0x98   :  { %v415_v48 = vrot.slane %v401_v47, %v3377_v17  ;;  %v417_v55 = vcombine.low %v273_v43, %v280_v44 }
  0x99   :  { %2778 = vmatmul.mubr.msk.f32.gmra.mrb[8].mxu0 %vm425_vm5, %v399_v42 }
  0x9a   :  { %541 = vmatprep.mubr.f32.mxu0 %v3126_v45  ;;  %v416_v49 = vcombine.low %v408_v1, %v415_v48  ;;  %v424_v50 = vrot.slane %v417_v55, %v3377_v17 }
  0x9d   :  { %2779 = vmatmul.mubr.msk.f32.gmra.mrb[10].mxu0 %vm425_vm5, %v416_v49 }
  0x9e   :  { %547 = vmatprep.mubr.f32.mxu0 %v3126_v45 }
  0xa1   :  { %2780 = vmatmul.mubr.msk.f32.gmra.mrb[12].mxu0 %vm425_vm5, %v424_v50  ;;  %vm1339_vm5 = vcmask 293888  }
 0x15c   :  { %v513_v58 = vpop.f32.mrb[0].mxu0 }
 0x15d   :  { %v514_v59 = vadd.f32 %v513_v58, %v3451_v54  ;;  %v515_v61 = vpop.f32.mrb[1].mxu0 }
 0x15e   :  { %v516_v62 = vadd.f32 %v515_v61, %v3457_v57 }
 0x15f   :  { %v554_v3 = vmax.f32 %v514_v59, 0.0 }
 0x160   :  { %v555_v5 = vmax.f32 %v516_v62, 0.0  ;;  %v519_v7 = vpop.f32.mrb[2].mxu0 }
 0x161   :  { %v580_v8 = vmul.f32 %v3464_v60, %v554_v3  ;;  %v520_v10 = vadd.f32 %v519_v7, %v3451_v54  ;;  %v521_v11 = vpop.f32.mrb[3].mxu0 }
 0x162   :  { %v581_v12 = vmul.f32 %v3468_v63, %v555_v5  ;;  %v522_v9 = vadd.f32 %v521_v11, %v3457_v57 }
 0x163   :  { %v606_v14 = vadd.f32 %v3471_v4, %v580_v8  ;;  %v556_v15 = vmax.f32 %v520_v10, 0.0 }
 0x164   :  { %v607_v16 = vadd.f32 %v3474_v6, %v581_v12  ;;  %v557_v18 = vmax.f32 %v522_v9, 0.0  ;;  %v525_v21 = vpop.f32.mrb[4].mxu0 }
 0x165   :  { %v582_v22 = vmul.f32 %v3464_v60, %v556_v15  ;;  %v526_v23 = vadd.f32 %v525_v21, %v3451_v54  ;;  %v527_v24 = vpop.f32.mrb[5].mxu0 }
 0x166   :  { %v634_v25 = vcombine.low %v606_v14, %v607_v16  ;;  %v635_v26 = vcombine.high %v606_v14, %v607_v16  ;;  %v583_v20 = vmul.f32 %v3468_v63, %v557_v18  ;;  %v528_v27 = vadd.f32 %v527_v24, %v3457_v57 }
 0x167   :  { %v608_v0 = vadd.f32 %v3471_v4, %v582_v22  ;;  %v558_v29 = vmax.f32 %v526_v23, 0.0 }
 0x168   :  { %v642_v30 = vrot.slane %v634_v25, %v3377_v17  ;;  %v649_v31 = vrot.slane %v635_v26, %v3377_v17  ;;  %v609_v32 = vadd.f32 %v3474_v6, %v583_v20  ;;  %v559_v2 = vmax.f32 %v528_v27, 0.0  ;;  %v531_v33 = vpop.f32.mrb[6].mxu0 }
 0x169   :  { %v584_v34 = vmul.f32 %v3464_v60, %v558_v29  ;;  %v532_v35 = vadd.f32 %v531_v33, %v3451_v54  ;;  %v3495_v36 = vpop.f32.mrb[7].mxu0 }
 0x16a   :  { %v650_v37 = vcombine.high %v642_v30, %v642_v30  ;;  %v651_v46 = vcombine.high %v649_v31, %v649_v31  ;;  %v2781_v38 = vrot.slane %v642_v30, 9  ;;  %v2783_v39 = vrot.slane %v649_v31, 9 }
 0x16b   :  { %v652_v40 = vcombine.low %v608_v0, %v609_v32  ;;  %v653_v41 = vcombine.high %v608_v0, %v609_v32  ;;  %v585_v42 = vmul.f32 %v3468_v63, %v559_v2  ;;  %v610_v50 = vadd.f32 %v3471_v4, %v584_v34 }
 0x16c   :  { %v2782_v43 = vrot.slane %v650_v37, 9  ;;  %v2784_v44 = vrot.slane %v651_v46, 9  ;;  %v3498_v47 = vmax.f32 %v642_v30, %v2781_v38  ;;  %v3500_v1 = vmax.f32 %v649_v31, %v2783_v39  ;;  %v537_v48 = vpop.f32.mrb[8].mxu0 }
 0x16d   :  { %v660_v55 = vrot.slane %v652_v40, %v3377_v17  ;;  %v667_v49 = vrot.slane %v653_v41, %v3377_v17  ;;  %v611_v52 = vadd.f32 %v3474_v6, %v585_v42  ;;  %v539_v56 = vpop.f32.mrb[9].mxu0  ;;  %v560_v61 = vmax.f32 %v532_v35, 0.0 }
 0x16e   :  { %v3506_v58 = vmax.f32 %v650_v37, %v2782_v43  ;;  %v3508_v19 = vmax.f32 %v651_v46, %v2784_v44  ;;  %v910_v59 = vrot.slane %v3498_v47, %v3442_v51  ;;  %v918_v62 = vrot.slane %v3500_v1, %v3442_v51 }
 0x16f   :  { %v1167_v3 = vrot.slane %v3498_v47, %v3487_v28  ;;  %v668_v5 = vcombine.high %v660_v55, %v660_v55  ;;  %v669_v7 = vcombine.high %v667_v49, %v667_v49  ;;  %v1175_v11 = vrot.slane %v3500_v1, %v3487_v28 }
 0x170   :  { %v914_v8 = vrot.slane %v3506_v58, %v3442_v51  ;;  %v922_v10 = vrot.slane %v3508_v19, %v3442_v51  ;;  %v2785_v12 = vrot.slane %v660_v55, 9  ;;  %v543_v9 = vpop.f32.mrb[10].mxu0  ;;  %v2787_v15 = vrot.slane %v667_v49, 9 }
 0x171   :  { %v2786_v14 = vrot.slane %v668_v5, 9  ;;  %v2788_v16 = vrot.slane %v669_v7, 9  ;;  %v670_v18 = vcombine.low %v610_v50, %v611_v52  ;;  %v545_v21 = vpop.f32.mrb[11].mxu0  ;;  %v671_v24 = vcombine.high %v610_v50, %v611_v52 }
 0x172   :  { %v1012_v22 = vsel %vm4682_vm6, %v914_v8, %v910_v59  ;;  %v3523_v23 = vmax.f32 %v660_v55, %v2785_v12  ;;  %v586_v25 = vmul.f32 %v3464_v60, %v560_v61  ;;  %v3529_v27 = vmax.f32 %v667_v49, %v2787_v15 }
 0x173   :  { %v1014_v26 = vsel %vm1013_vm7, %v918_v62, %v1012_v22  ;;  %v3527_v20 = vmax.f32 %v668_v5, %v2786_v14  ;;  %v3531_v0 = vmax.f32 %v669_v7, %v2788_v16  ;;  %v678_v31 = vrot.slane %v670_v18, %v3377_v17 }
 0x174   :  { %v1016_v29 = vsel %vm1015_vm8, %v922_v10, %v1014_v26  ;;  %v926_v30 = vrot.slane %v3523_v23, %v3442_v51  ;;  %v685_v32 = vrot.slane %v671_v24, %v3377_v17  ;;  %v549_v2 = vpop.f32.mrb[12].mxu0  ;;  %v934_v34 = vrot.slane %v3529_v27, %v3442_v51 }
 0x175   :  { %v930_v33 = vrot.slane %v3527_v20, %v3442_v51  ;;  %v938_v35 = vrot.slane %v3531_v0, %v3442_v51  ;;  %v612_v37 = vadd.f32 %v3471_v4, %v586_v25  ;;  %v551_v46 = vpop.f32.mrb[13].mxu0  ;;  %v686_v39 = vcombine.high %v678_v31, %v678_v31 }
 0x176   :  { %v1018_v38 = vsel %vm1017_vm9, %v926_v30, %v1016_v29  ;;  %v687_v40 = vcombine.high %v685_v32, %v685_v32  ;;  %v2789_v41 = vrot.slane %v678_v31, 9  ;;  %v2791_v43 = vrot.slane %v685_v32, 9 }
 0x177   :  { %v1020_v42 = vsel %vm1019_vm10, %v930_v33, %v1018_v38  ;;  %v534_v44 = vadd.f32 %v3495_v36, %v3457_v57  ;;  %v538_v55 = vadd.f32 %v537_v48, %v3451_v54  ;;  %v2790_v50 = vrot.slane %v686_v39, 9 }
 0x178   :  { %v1022_v49 = vsel %vm1021_vm11, %v934_v34, %v1020_v42  ;;  %v2792_v52 = vrot.slane %v687_v40, 9  ;;  %v3551_v59 = vmax.f32 %v678_v31, %v2789_v41  ;;  %v3556_v62 = vmax.f32 %v685_v32, %v2791_v43 }
 0x179   :  { %v3554_v61 = vsel %vm1023_vm12, %v938_v35, %v1022_v49  ;;  %v561_v5 = vmax.f32 %v534_v44, 0.0  ;;  %v562_v7 = vmax.f32 %v538_v55, 0.0  ;;  %v3558_v8 = vmax.f32 %v686_v39, %v2790_v50 }
 0x17a   :  { %v3560_v10 = vmax.f32 %v687_v40, %v2792_v52  ;;  %v942_v36 = vrot.slane %v3551_v59, %v3442_v51  ;;  %v540_v48 = vadd.f32 %v539_v56, %v3457_v57  ;;  %1044 = vrot.lane.b32.xlu0 %v3554_v61, %s3128_s2  ;;  %v950_v12 = vrot.slane %v3556_v62, %v3442_v51 }
 0x17b   :  { %v587_v14 = vmul.f32 %v3468_v63, %v561_v5  ;;  %v588_v15 = vmul.f32 %v3464_v60, %v562_v7  ;;  %v544_v16 = vadd.f32 %v543_v9, %v3451_v54  ;;  %v946_v18 = vrot.slane %v3558_v8, %v3442_v51 }
 0x17c   :  { %v954_v22 = vrot.slane %v3560_v10, %v3442_v51  ;;  %v563_v56 = vmax.f32 %v540_v48, 0.0  ;;  %v546_v24 = vadd.f32 %v545_v21, %v3457_v57  ;;  %v550_v30 = vadd.f32 %v549_v2, %v3451_v54 }
 0x17d   :  { %v613_v25 = vadd.f32 %v3474_v6, %v587_v14  ;;  %v614_v26 = vadd.f32 %v3471_v4, %v588_v15  ;;  %v564_v29 = vmax.f32 %v544_v16, 0.0  ;;  %v1025_v31 = vsel %vm4682_vm6, %v946_v18, %v942_v36 }
 0x17e   :  { %v589_v9 = vmul.f32 %v3468_v63, %v563_v56  ;;  %v565_v32 = vmax.f32 %v546_v24, 0.0  ;;  %1056 = vrot.lane.b32.xlu0 %v3554_v61, %s3129_s3  ;;  %v3585_v33 = vadd.f32 %v551_v46, %v3457_v57  ;;  %v1026_v21 = vsel %vm1013_vm7, %v950_v12, %v1025_v31 }
 0x17f   :  { %v688_v34 = vcombine.low %v612_v37, %v613_v25  ;;  %v689_v35 = vcombine.high %v612_v37, %v613_v25  ;;  %v590_v38 = vmul.f32 %v3464_v60, %v564_v29  ;;  %v1027_v54 = vsel %vm1015_vm8, %v954_v22, %v1026_v21 }
 0x180   :  { %v615_v2 = vadd.f32 %v3474_v6, %v589_v9  ;;  %v591_v39 = vmul.f32 %v3468_v63, %v565_v32  ;;  %v566_v40 = vmax.f32 %v550_v30, 0.0  ;;  %v1171_v41 = vrot.slane %v3506_v58, %v3487_v28 }
 0x181   :  { %v696_v42 = vrot.slane %v688_v34, %v3377_v17  ;;  %v703_v57 = vrot.slane %v689_v35, %v3377_v17  ;;  %v616_v46 = vadd.f32 %v3471_v4, %v590_v38  ;;  %v567_v30 = vmax.f32 %v3585_v33, 0.0 }
 0x182   :  { %v706_v43 = vcombine.low %v614_v26, %v615_v2  ;;  %v707_v37 = vcombine.high %v614_v26, %v615_v2  ;;  %v617_v44 = vadd.f32 %v3474_v6, %v591_v39  ;;  %1068 = vrot.lane.b32.xlu0 %v3554_v61, %s3130_s4  ;;  %v592_v55 = vmul.f32 %v3464_v60, %v566_v40 }
 0x183   :  { %v704_v49 = vcombine.high %v696_v42, %v696_v42  ;;  %v705_v50 = vcombine.high %v703_v57, %v703_v57  ;;  %v2793_v52 = vrot.slane %v696_v42, 9  ;;  %v2795_v5 = vrot.slane %v703_v57, 9 }
 0x184   :  { %v714_v7 = vrot.slane %v706_v43, %v3377_v17  ;;  %v721_v36 = vrot.slane %v707_v37, %v3377_v17  ;;  %v724_v48 = vcombine.low %v616_v46, %v617_v44  ;;  %v725_v12 = vcombine.high %v616_v46, %v617_v44 }
 0x185   :  { %v2794_v14 = vrot.slane %v704_v49, 9  ;;  %v2796_v15 = vrot.slane %v705_v50, 9  ;;  %v3603_v16 = vmax.f32 %v696_v42, %v2793_v52  ;;  %v3605_v18 = vmax.f32 %v703_v57, %v2795_v5 }
 0x186   :  { %v722_v22 = vcombine.high %v714_v7, %v714_v7  ;;  %v723_v56 = vcombine.high %v721_v36, %v721_v36  ;;  %v2797_v24 = vrot.slane %v714_v7, 9  ;;  %v2799_v60 = vrot.slane %v721_v36, 9  ;;  %1080 = vrot.lane.b32.xlu0 %v3554_v61, %s3131_s28 }
 0x187   :  { %v3609_v25 = vmax.f32 %v704_v49, %v2794_v14  ;;  %v3611_v26 = vmax.f32 %v705_v50, %v2796_v15  ;;  %v958_v29 = vrot.slane %v3603_v16, %v3442_v51  ;;  %v966_v31 = vrot.slane %v3605_v18, %v3442_v51 }
 0x188   :  { %v2798_v9 = vrot.slane %v722_v22, 9  ;;  %v2800_v32 = vrot.slane %v723_v56, 9  ;;  %v3618_v21 = vmax.f32 %v714_v7, %v2797_v24  ;;  %v3631_v39 = vmax.f32 %v721_v36, %v2799_v60 }
 0x189   :  { %v962_v34 = vrot.slane %v3609_v25, %v3442_v51  ;;  %v970_v35 = vrot.slane %v3611_v26, %v3442_v51  ;;  %v3625_v38 = vsel %vm1017_vm9, %v958_v29, %v1027_v54  ;;  %v1219_v2 = vrot.slane %v3609_v25, %v3487_v28 }
 0x18a   :  { %v3629_v33 = vmax.f32 %v722_v22, %v2798_v9  ;;  %v3633_v40 = vmax.f32 %v723_v56, %v2800_v32  ;;  %v974_v42 = vrot.slane %v3618_v21, %v3442_v51  ;;  %1046 = vrot.lane.b32.xlu1 %v3625_v38, %s3128_s2  ;;  %v732_v54 = vrot.slane %v724_v48, %v3377_v17 }
 0x18b   :  { %v1029_v57 = vsel %vm4682_vm6, %v966_v31, %v962_v34  ;;  %v739_v46 = vrot.slane %v725_v12, %v3377_v17  ;;  %1092 = vrot.lane.b32.xlu0 %v3554_v61, %s3132_s29  ;;  %v618_v43 = vadd.f32 %v3471_v4, %v592_v55  ;;  %v982_v49 = vrot.slane %v3631_v39, %v3442_v51 }
 0x18c   :  { %v1030_v37 = vsel %vm1013_vm7, %v970_v35, %v1029_v57  ;;  %v978_v44 = vrot.slane %v3629_v33, %v3442_v51  ;;  %v986_v50 = vrot.slane %v3633_v40, %v3442_v51  ;;  %v740_v5 = vcombine.high %v732_v54, %v732_v54 }
 0x18d   :  { %v1031_v52 = vsel %vm1015_vm8, %v974_v42, %v1030_v37  ;;  %v741_v7 = vcombine.high %v739_v46, %v739_v46  ;;  %v2801_v36 = vrot.slane %v732_v54, 9  ;;  %v2803_v12 = vrot.slane %v739_v46, 9 }
 0x18e   :  { %v1032_v48 = vsel %vm1017_vm9, %v978_v44, %v1031_v52  ;;  %1058 = vrot.lane.b32.xlu1 %v3625_v38, %s3129_s3  ;;  %v593_v4 = vmul.f32 %v3468_v63, %v567_v30  ;;  %v1179_v55 = vrot.slane %v3508_v19, %v3487_v28  ;;  %v2802_v15 = vrot.slane %v740_v5, 9 }
 0x18f   :  { %v1033_v14 = vsel %vm1019_vm10, %v982_v49, %v1032_v48  ;;  %v2804_v22 = vrot.slane %v741_v7, 9  ;;  %v3660_v56 = vmax.f32 %v732_v54, %v2801_v36  ;;  %1104 = vrot.lane.b32.xlu0 %v3554_v61, %s3133_s30  ;;  %v3665_v60 = vmax.f32 %v739_v46, %v2803_v12 }
 0x190   :  { %v1034_v24 = vsel %vm1021_vm11, %v986_v50, %v1033_v14  ;;  %v619_v29 = vadd.f32 %v3474_v6, %v593_v4  ;;  %v1183_v63 = vrot.slane %v3523_v23, %v3487_v28  ;;  %v3670_v19 = vmax.f32 %v740_v5, %v2802_v15 }
 0x191   :  { %v3672_v30 = vmax.f32 %v741_v7, %v2804_v22  ;;  %v990_v31 = vrot.slane %v3660_v56, %v3442_v51  ;;  %v1187_v9 = vrot.slane %v3527_v20, %v3487_v28  ;;  %v998_v32 = vrot.slane %v3665_v60, %v3442_v51 }
 0x192   :  { %1070 = vrot.lane.b32.xlu1 %v3625_v38, %s3130_s4  ;;  %v742_v6 = vcombine.low %v618_v43, %v619_v29  ;;  %v1191_v23 = vrot.slane %v3529_v27, %v3487_v28  ;;  %v1195_v34 = vrot.slane %v3531_v0, %v3487_v28  ;;  %v994_v35 = vrot.slane %v3670_v19, %v3442_v51 }
 0x193   :  { %v1002_v42 = vrot.slane %v3672_v30, %v3442_v51  ;;  %v3691_v20 = vsel %vm1023_vm12, %v990_v31, %v1034_v24  ;;  %1116 = vrot.lane.b32.xlu0 %v3554_v61, %s3134_s14  ;;  %v1268_v27 = vsel %vm4682_vm6, %v1171_v41, %v1167_v3  ;;  %v1199_v54 = vrot.slane %v3551_v59, %v3487_v28 }
 0x194   :  { %v749_v0 = vrot.slane %v742_v6, %v3377_v17  ;;  %v1269_v57 = vsel %vm1013_vm7, %v1175_v11, %v1268_v27  ;;  %v1203_v46 = vrot.slane %v3558_v8, %v3487_v28  ;;  %v1036_v47 = vsel %vm4682_vm6, %v998_v32, %v994_v35  ;;  %v1663_v35 = vld [vmem:[%s4673_s5 + $0x18] sm:$0xff] }
 0x195   :  { %v1270_v43 = vsel %vm1015_vm8, %v1179_v55, %v1269_v57  ;;  %v1207_v58 = vrot.slane %v3556_v62, %v3487_v28  ;;  %v1211_v17 = vrot.slane %v3560_v10, %v3487_v28  ;;  %v1037_v1 = vsel %vm1013_vm7, %v1002_v42, %v1036_v47  ;;  %v1660_v42 = vld [vmem:[%s4673_s5] sm:$0xff]  ;;  %v1662_v57 = vld [vmem:[%s4673_s5 + $0x10] sm:$0xff] }
 0x196   :  { %1082 = vrot.lane.b32.xlu1 %v3625_v38, %s3131_s28  ;;  %v750_v3 = vcombine.high %v749_v0, %v749_v0  ;;  %v2805_v11 = vrot.slane %v749_v0, 9  ;;  %v1271_v59 = vsel %vm1017_vm9, %v1183_v63, %v1270_v43  ;;  %v1215_v62 = vrot.slane %v3603_v16, %v3487_v28 }
 0x197   :  { %1128 = vrot.lane.b32.xlu0 %v3554_v61, %s3135_s15  ;;  %v1272_v8 = vsel %vm1019_vm10, %v1187_v9, %v1271_v59  ;;  %v1275_v10 = vsel %vm4682_vm6, %v1203_v46, %v1199_v54  ;;  %v1227_v41 = vrot.slane %v3611_v26, %v3487_v28  ;;  %v1223_v52 = vrot.slane %v3605_v18, %v3487_v28  ;;  %v1665_v54 = vld [vmem:[%s4673_s5 + $0x28] sm:$0xff]  ;;  %v1667_v46 = vld [vmem:[%s4673_s5 + $0x38] sm:$0xff] }
 0x198   :  { %v2806_v37 = vrot.slane %v750_v3, 9  ;;  %v879_v44 = vmax.f32 %v749_v0, %v2805_v11  ;;  %v1273_v49 = vsel %vm1021_vm11, %v1191_v23, %v1272_v8  ;;  %v1276_v50 = vsel %vm1013_vm7, %v1207_v58, %v1275_v10  ;;  %v1664_v58 = vld [vmem:[%s4673_s5 + $0x20] sm:$0xff]  ;;  %v1670_v10 = vld [vmem:[%s4673_s5 + $0x50] sm:$0xff] }
 0x199   :  { %v1274_v5 = vsel %vm1023_vm12, %v1195_v34, %v1273_v49  ;;  %v1277_v7 = vsel %vm1015_vm8, %v1211_v17, %v1276_v50  ;;  %v1231_v16 = vrot.slane %v3618_v21, %v3487_v28  ;;  %v1235_v12 = vrot.slane %v3629_v33, %v3487_v28  ;;  %v1661_v34 = vld [vmem:[%s4673_s5 + $0x8] sm:$0xff]  ;;  %v1666_v17 = vld [vmem:[%s4673_s5 + $0x30] sm:$0xff] }
 0x19a   :  { %1094 = vrot.lane.b32.xlu1 %v3625_v38, %s3132_s29  ;;  %v880_v26 = vmax.f32 %v750_v3, %v2806_v37  ;;  %v1006_v36 = vrot.slane %v879_v44, %v3442_v51  ;;  %v1278_v48 = vsel %vm1017_vm9, %v1215_v62, %v1277_v7  ;;  %v1239_v18 = vrot.slane %v3631_v39, %v3487_v28  ;;  %v1671_v3 = vld [vmem:[%s4673_s5 + $0x58] sm:$0xff]  ;;  %v1668_v62 = vld [vmem:[%s4673_s5 + $0x40] sm:$0xff]  ;;  %v1673_v37 = vld [vmem:[%s4673_s5 + $0x68] sm:$0xff] }
 0x19b   :  { %1140 = vrot.lane.b32.xlu0 %v3554_v61, %s3136_s16  ;;  %v1247_v21 = vrot.slane %v3660_v56, %v3487_v28  ;;  %v1279_v4 = vsel %vm4682_vm6, %v1223_v52, %v1219_v2  ;;  %v1251_v55 = vrot.slane %v3670_v19, %v3487_v28  ;;  %v1255_v39 = vrot.slane %v3665_v60, %v3487_v28  ;;  %v1674_v7 = vld [vmem:[%s4673_s5 + $0x70] sm:$0xff] }
 0x19c   :  { %v1010_v33 = vrot.slane %v880_v26, %v3442_v51  ;;  %v1038_v14 = vsel %vm1015_vm8, %v1006_v36, %v1037_v1  ;;  %v1280_v15 = vsel %vm1013_vm7, %v1227_v41, %v1279_v4  ;;  %v1259_v56 = vrot.slane %v3672_v30, %v3487_v28  ;;  %v1669_v1 = vld [vmem:[%s4673_s5 + $0x48] sm:$0xff]  ;;  %v1679_v36 = vld [vmem:[%s4673_s5 + $0x98] sm:$0xff]  ;;  %v1678_v4 = vld [vmem:[%s4673_s5 + $0x90] sm:$0xff] }
 0x19d   :  { %v1281_v22 = vsel %vm1015_vm8, %v1231_v16, %v1280_v15  ;;  %v1263_v25 = vrot.slane %v879_v44, %v3487_v28  ;;  %v1267_v2 = vrot.slane %v880_v26, %v3487_v28  ;;  %v1243_v29 = vrot.slane %v3633_v40, %v3487_v28  ;;  %v1675_v44 = vld [vmem:[%s4673_s5 + $0x78] sm:$0xff]  ;;  %v1677_v26 = vld [vmem:[%s4673_s5 + $0x88] sm:$0xff] }
 0x19e   :  { %1106 = vrot.lane.b32.xlu1 %v3625_v38, %s3133_s30  ;;  %v3768_v24 = vsel %vm1017_vm9, %v1010_v33, %v1038_v14  ;;  %v1282_v60 = vsel %vm1017_vm9, %v1235_v12, %v1281_v22  ;;  %v1286_v63 = vsel %vm4682_vm6, %v1255_v39, %v1251_v55  ;;  %v2924_v0 = vpack.c.bf16 %v1663_v35, %v1661_v34  ;;  %v1681_v33 = vld [vmem:[%s4673_s5 + $0xa8] sm:$0xff]  ;;  %v1683_v14 = vld [vmem:[%s4673_s5 + $0xb8] sm:$0xff] }
 0x19f   :  { %1152 = vrot.lane.b32.xlu0 %v3554_v61, %s3137_s17  ;;  %v1283_v19 = vsel %vm1019_vm10, %v1239_v18, %v1282_v60  ;;  %v1287_v30 = vsel %vm1013_vm7, %v1259_v56, %v1286_v63  ;;  %v2926_v47 = vpack.c.bf16 %v1662_v57, %v1660_v42  ;;  %v2928_v43 = vpack.c.bf16 %v1667_v46, %v1665_v54  ;;  %v1680_v56 = vld [vmem:[%s4673_s5 + $0xa0] sm:$0xff]  ;;  %v1687_v60 = vld [vmem:[%s4673_s5 + $0xd8] sm:$0xff]  ;;  %v1690_v54 = vld [vmem:[%s4673_s5 + $0xf0] sm:$0xff] }
 0x1a0   :  { %v1284_v31 = vsel %vm1021_vm11, %v1243_v29, %v1283_v19  ;;  %v1288_v9 = vsel %vm1015_vm8, %v1263_v25, %v1287_v30  ;;  %2925 = vmatprep.subr.bf16.mxu1 %v2924_v0  ;;  %v2930_v11 = vpack.c.bf16 %v1666_v17, %v1664_v58  ;;  %v2932_v8 = vpack.c.bf16 %v1671_v3, %v1669_v1  ;;  %v1682_v25 = vld [vmem:[%s4673_s5 + $0xb0] sm:$0xff]  ;;  %v1685_v29 = vld [vmem:[%s4673_s5 + $0xc8] sm:$0xff]  ;;  %v1691_v34 = vld [vmem:[%s4673_s5 + $0xf8] sm:$0xff] }
 0x1a1   :  { %v1285_v32 = vsel %vm1023_vm12, %v1247_v21, %v1284_v31  ;;  %v1289_v28 = vsel %vm1017_vm9, %v1267_v2, %v1288_v9  ;;  %2927 = vmatpush1.bf16.msra.mxu1 %v2926_v47  ;;  %v2934_v49 = vpack.c.bf16 %v1670_v10, %v1668_v62  ;;  %v2936_v52 = vpack.c.bf16 %v1675_v44, %v1673_v37  ;;  %v1676_v21 = vld [vmem:[%s4673_s5 + $0x80] sm:$0xff]  ;;  %v1686_v9 = vld [vmem:[%s4673_s5 + $0xd0] sm:$0xff]  ;;  %v1693_v47 = vld [vmem:[%s4673_s5 + $0x108] sm:$0xff] }
 0x1a2   :  { %1118 = vrot.lane.b32.xlu1 %v3625_v38, %s3134_s14  ;;  %2929 = vmatprep.subr.bf16.mxu1 %v2928_v43  ;;  %v2940_v18 = vpack.c.bf16 %v1679_v36, %v1677_v26  ;;  %v2942_v15 = vpack.c.bf16 %v1678_v4, %v1676_v21  ;;  %v2944_v22 = vpack.c.bf16 %v1683_v14, %v1681_v33  ;;  %v1684_v31 = vld [vmem:[%s4673_s5 + $0xc0] sm:$0xff]  ;;  %v1695_v43 = vld [vmem:[%s4673_s5 + $0x118] sm:$0xff]  ;;  %v1697_v62 = vld [vmem:[%s4673_s5 + $0x128] sm:$0xff]  ;;  %vm1344_vm7 = vcmask 343040  }
 0x1a3   :  { %1290 = vrot.lane.b32.xlu0 %v1274_v5, %s3138_s0  ;;  %v2946_v63 = vpack.c.bf16 %v1682_v25, %v1680_v56  ;;  %v2948_v30 = vpack.c.bf16 %v1687_v60, %v1685_v29  ;;  %v2950_v35 = vpack.c.bf16 %v1686_v9, %v1684_v31  ;;  %v1688_v57 = vld [vmem:[%s4673_s5 + $0xe0] sm:$0xff]  ;;  %v2956_v1 = vpack.c.bf16 %v1695_v43, %v1693_v47  ;;  %v1699_v10 = vld [vmem:[%s4673_s5 + $0x138] sm:$0xff] }
 0x1a4   :  { %v2954_v58 = vpack.c.bf16 %v1690_v54, %v1688_v57  ;;  %v1692_v3 = vld [vmem:[%s4673_s5 + $0x100] sm:$0xff]  ;;  %vm1349_vm8 = vcmask 392192   ;;  %vm1354_vm9 = vcmask 441344   ;;  %vm1359_vm10 = vcmask 490496  }
 0x1a5   :  { %2931 = vmatpush1.bf16.msra.mxu1 %v2930_v11  ;;  %v1694_v11 = vld [vmem:[%s4673_s5 + $0x110] sm:$0xff]  ;;  %vm1364_vm11 = vcmask 539648   ;;  %vm1382_vm12 = vcmask 506880   ;;  %vm1369_vm6 = vcmask 588800  }
 0x1a6   :  { %1130 = vrot.lane.b32.xlu1 %v3625_v38, %s3135_s15  ;;  %2933 = vmatprep.subr.bf16.mxu1 %v2932_v8  ;;  %v2958_v37 = vpack.c.bf16 %v1694_v11, %v1692_v3 }
 0x1a7   :  { %1374 = vrot.lane.b32.xlu0 %v3554_v61, %s3138_s0 }
 0x1a9   :  { %2935 = vmatpush1.bf16.msra.mxu1 %v2934_v49  ;;  %v2960_v49 = vpack.c.bf16 %v1699_v10, %v1697_v62 }
 0x1aa   :  { %1142 = vrot.lane.b32.xlu1 %v3625_v38, %s3136_s16  ;;  %2937 = vmatprep.subr.bf16.mxu1 %v2936_v52  ;;  %v1696_v52 = vld [vmem:[%s4673_s5 + $0x120] sm:$0xff] }
 0x1ab   :  { %1302 = vrot.lane.b32.xlu0 %v1274_v5, %s3125_s21 }
 0x1ae   :  { %1154 = vrot.lane.b32.xlu1 %v3625_v38, %s3137_s17 }
 0x1af   :  { %1391 = vrot.lane.b32.xlu0 %v1274_v5, %s3139_s19  ;;  %v1672_v5 = vld [vmem:[%s4673_s5 + $0x60] sm:$0xff] }
 0x1b2   :  { %1292 = vrot.lane.b32.xlu1 %v1278_v48, %s3138_s0 }
 0x1b3   :  { %1048 = vrot.lane.b32.xlu0 %v3691_v20, %s3128_s2 }
 0x1b6   :  { %1376 = vrot.lane.b32.xlu1 %v3625_v38, %s3138_s0 }
 0x1b7   :  { %1060 = vrot.lane.b32.xlu0 %v3691_v20, %s3129_s3 }
 0x1ba   :  { %1304 = vrot.lane.b32.xlu1 %v1278_v48, %s3125_s21 }
 0x1bb   :  { %1072 = vrot.lane.b32.xlu0 %v3691_v20, %s3130_s4 }
 0x1be   :  { %1393 = vrot.lane.b32.xlu1 %v1278_v48, %s3139_s19  ;;  %v2938_v48 = vpack.c.bf16 %v1674_v7, %v1672_v5  ;;  %v1698_v5 = vld [vmem:[%s4673_s5 + $0x130] sm:$0xff] }
 0x1bf   :  { %1084 = vrot.lane.b32.xlu0 %v3691_v20, %s3131_s28  ;;  %v2962_v26 = vpack.c.bf16 %v1698_v5, %v1696_v52 }
 0x1c0   :  { %2939 = vmatpush1.bf16.msra.mxu1 %v2938_v48 }
 0x1c1   :  { %2941 = vmatprep.subr.bf16.mxu1 %v2940_v18 }
 0x1c2   :  { %1050 = vrot.lane.b32.xlu1 %v3768_v24, %s3128_s2 }
 0x1c3   :  { %1096 = vrot.lane.b32.xlu0 %v3691_v20, %s3132_s29 }
 0x1c4   :  { %2943 = vmatpush1.bf16.msra.mxu1 %v2942_v15 }
 0x1c5   :  { %2945 = vmatprep.subr.bf16.mxu1 %v2944_v22 }
 0x1c6   :  { %1062 = vrot.lane.b32.xlu1 %v3768_v24, %s3129_s3 }
 0x1c7   :  { %1108 = vrot.lane.b32.xlu0 %v3691_v20, %s3133_s30 }
 0x1c8   :  { %2947 = vmatpush1.bf16.msra.mxu1 %v2946_v63 }
 0x1c9   :  { %2949 = vmatprep.subr.bf16.mxu1 %v2948_v30 }
 0x1ca   :  { %1074 = vrot.lane.b32.xlu1 %v3768_v24, %s3130_s4 }
 0x1cb   :  { %1120 = vrot.lane.b32.xlu0 %v3691_v20, %s3134_s14 }
 0x1cc   :  { %2951 = vmatpush1.bf16.msra.mxu1 %v2950_v35 }
 0x1ce   :  { %1086 = vrot.lane.b32.xlu1 %v3768_v24, %s3131_s28 }
 0x1cf   :  { %1132 = vrot.lane.b32.xlu0 %v3691_v20, %s3135_s15 }
 0x1d2   :  { %1098 = vrot.lane.b32.xlu1 %v3768_v24, %s3132_s29 }
 0x1d3   :  { %1144 = vrot.lane.b32.xlu0 %v3691_v20, %s3136_s16 }
 0x1d6   :  { %1110 = vrot.lane.b32.xlu1 %v3768_v24, %s3133_s30 }
 0x1d7   :  { %1156 = vrot.lane.b32.xlu0 %v3691_v20, %s3137_s17 }
 0x1da   :  { %1122 = vrot.lane.b32.xlu1 %v3768_v24, %s3134_s14 }
 0x1db   :  { %1294 = vrot.lane.b32.xlu0 %v1285_v32, %s3138_s0 }
 0x1de   :  { %1134 = vrot.lane.b32.xlu1 %v3768_v24, %s3135_s15 }
 0x1df   :  { %1378 = vrot.lane.b32.xlu0 %v3691_v20, %s3138_s0 }
 0x1e2   :  { %1146 = vrot.lane.b32.xlu1 %v3768_v24, %s3136_s16 }
 0x1e3   :  { %1306 = vrot.lane.b32.xlu0 %v1285_v32, %s3125_s21 }
 0x1e6   :  { %1158 = vrot.lane.b32.xlu1 %v3768_v24, %s3137_s17 }
 0x1e7   :  { %1395 = vrot.lane.b32.xlu0 %v1285_v32, %s3139_s19 }
 0x1ea   :  { %1296 = vrot.lane.b32.xlu1 %v1289_v28, %s3138_s0 }
 0x1ec   :  { %v3846_v40 = vpop.permute.xlu0 %1044 }
 0x1ed   :  { %v1315_v33 = vsel %vm1314_vm13, %v3554_v61, %v3846_v40 }
 0x1ee   :  { %1380 = vrot.lane.b32.xlu1 %v3768_v24, %s3138_s0 }
 0x1f0   :  { %v3850_v6 = vpop.permute.xlu0 %1056 }
 0x1f1   :  { %v1403_v21 = vsel %vm1314_vm13, %v3846_v40, %v3850_v6  ;;  %v1320_v15 = vsel %vm1319_vm14, %v1315_v33, %v3850_v6 }
 0x1f2   :  { %1308 = vrot.lane.b32.xlu1 %v1289_v28, %s3125_s21 }
 0x1f4   :  { %v3853_v23 = vpop.permute.xlu0 %1068 }
 0x1f5   :  { %v1407_v14 = vsel %vm1319_vm14, %v1403_v21, %v3853_v23  ;;  %v1325_v56 = vsel %vm1324_vm15, %v1320_v15, %v3853_v23 }
 0x1f6   :  { %1397 = vrot.lane.b32.xlu1 %v1289_v28, %s3139_s19  ;;  %v1689_v28 = vld [vmem:[%s4673_s5 + $0xe8] sm:$0xff] }
 0x1f7   :  { %v2952_v0 = vpack.c.bf16 %v1691_v34, %v1689_v28 }
 0x1f8   :  { %v3865_v27 = vpop.permute.xlu0 %1080 }
 0x1f9   :  { %2953 = vmatprep.subr.bf16.mxu1 %v2952_v0  ;;  %v1411_v22 = vsel %vm1324_vm15, %v1407_v14, %v3865_v27  ;;  %v1330_v6 = vsel %vm1329_vm2, %v1325_v56, %v3865_v27  ;;  %v1700_v56 = vld [vmem:[%s4673_s5 + $0x140] sm:$0xff] }
 0x1fa   :  { %2955 = vmatpush1.bf16.msra.mxu1 %v2954_v58 }
 0x1fb   :  { %2957 = vmatprep.subr.bf16.mxu1 %v2956_v1 }
 0x1fc   :  { %v3888_v59 = vpop.permute.xlu1 %1046 }
 0x1fd   :  { %v3896_v41 = vpop.permute.xlu0 %1092  ;;  %v1316_v40 = vsel %vm1314_vm13, %v3625_v38, %v3888_v59 }
 0x1fe   :  { %2959 = vmatpush1.bf16.msra.mxu1 %v2958_v37  ;;  %v1415_v25 = vsel %vm1329_vm2, %v1411_v22, %v3896_v41  ;;  %v1335_v30 = vsel %vm1334_vm4, %v1330_v6, %v3896_v41  ;;  %v1703_v22 = vld [vmem:[%s4673_s5 + $0x158] sm:$0xff] }
 0x1ff   :  { %2961 = vmatprep.subr.bf16.mxu1 %v2960_v49 }
 0x200   :  { %v3904_v50 = vpop.permute.xlu1 %1058 }
 0x201   :  { %v3912_v16 = vpop.permute.xlu0 %1104  ;;  %v1321_v23 = vsel %vm1319_vm14, %v1316_v40, %v3904_v50  ;;  %v1404_v63 = vsel %vm1314_vm13, %v3888_v59, %v3904_v50 }
 0x202   :  { %2963 = vmatpush1.bf16.msra.mxu1 %v2962_v26  ;;  %v1419_v29 = vsel %vm1334_vm4, %v1415_v25, %v3912_v16  ;;  %v1340_v31 = vsel %vm1339_vm5, %v1335_v30, %v3912_v16  ;;  %v1707_v30 = vld [vmem:[%s4673_s5 + $0x178] sm:$0xff] }
 0x204   :  { %v3920_v12 = vpop.permute.xlu1 %1070 }
 0x205   :  { %v3928_v55 = vpop.permute.xlu0 %1116  ;;  %v1408_v27 = vsel %vm1319_vm14, %v1404_v63, %v3920_v12  ;;  %v1326_v59 = vsel %vm1324_vm15, %v1321_v23, %v3920_v12  ;;  %v1702_v23 = vld [vmem:[%s4673_s5 + $0x150] sm:$0xff]  ;;  %v1705_v63 = vld [vmem:[%s4673_s5 + $0x168] sm:$0xff] }
 0x206   :  { %v1423_v38 = vsel %vm1339_vm5, %v1419_v29, %v3928_v55  ;;  %v1345_v50 = vsel %vm1344_vm7, %v1340_v31, %v3928_v55  ;;  %v2968_v31 = vpack.c.bf16 %v1707_v30, %v1705_v63 }
 0x208   :  { %v3936_v39 = vpop.permute.xlu1 %1082 }
 0x209   :  { %v3944_v2 = vpop.permute.xlu0 %1128  ;;  %v1412_v41 = vsel %vm1324_vm15, %v1408_v27, %v3936_v39  ;;  %v1331_v16 = vsel %vm1329_vm2, %v1326_v59, %v3936_v39  ;;  %v2966_v27 = vpack.c.bf16 %v1702_v23, %v1700_v56 }
 0x20a   :  { %v1427_v9 = vsel %vm1344_vm7, %v1423_v38, %v3944_v2  ;;  %v1350_v57 = vsel %vm1349_vm8, %v1345_v50, %v3944_v2  ;;  %v1709_v50 = vld [vmem:[%s4673_s5 + $0x188] sm:$0xff] }
 0x20c   :  { %v3952_v19 = vpop.permute.xlu1 %1094 }
 0x20d   :  { %v3960_v32 = vpop.permute.xlu0 %1140  ;;  %v1416_v0 = vsel %vm1329_vm2, %v1412_v41, %v3952_v19  ;;  %v1336_v55 = vsel %vm1334_vm4, %v1331_v16, %v3952_v19 }
 0x20e   :  { %v1431_v34 = vsel %vm1349_vm8, %v1427_v9, %v3960_v32  ;;  %v1355_v39 = vsel %vm1354_vm9, %v1350_v57, %v3960_v32  ;;  %v1704_v9 = vld [vmem:[%s4673_s5 + $0x160] sm:$0xff] }
 0x210   :  { %v3968_v42 = vpop.permute.xlu1 %1106 }
 0x211   :  { %v3976_v46 = vpop.permute.xlu0 %1152  ;;  %v1420_v47 = vsel %vm1334_vm4, %v1416_v0, %v3968_v42  ;;  %v1341_v58 = vsel %vm1339_vm5, %v1336_v55, %v3968_v42  ;;  %v1710_v55 = vld [vmem:[%s4673_s5 + $0x190] sm:$0xff] }
 0x212   :  { %v1435_v12 = vsel %vm1354_vm9, %v1431_v34, %v3976_v46  ;;  %v1360_v1 = vsel %vm1359_vm10, %v1355_v39, %v3976_v46  ;;  %v1711_v34 = vld [vmem:[%s4673_s5 + $0x198] sm:$0xff] }
 0x213   :  { %v2972_v57 = vpack.c.bf16 %v1711_v34, %v1709_v50  ;;  %v1715_v39 = vld [vmem:[%s4673_s5 + $0x1b8] sm:$0xff] }
 0x214   :  { %v3984_v17 = vpop.permute.xlu1 %1118 }
 0x215   :  { %v3992_v8 = vpop.permute.xlu0 %1290  ;;  %v1424_v2 = vsel %vm1339_vm5, %v1420_v47, %v3984_v17  ;;  %v1346_v3 = vsel %vm1344_vm7, %v1341_v58, %v3984_v17  ;;  %v1713_v47 = vld [vmem:[%s4673_s5 + $0x1a8] sm:$0xff] }
 0x216   :  { %v1365_v37 = vsel %vm1364_vm11, %v1360_v1, %v3992_v8  ;;  %v2976_v1 = vpack.c.bf16 %v1715_v39, %v1713_v47 }
 0x218   :  { %v4000_v44 = vpop.permute.xlu1 %1130 }
 0x219   :  { %v1375_v7 = vpop.permute.xlu0 %1374  ;;  %v1428_v32 = vsel %vm1344_vm7, %v1424_v2, %v4000_v44  ;;  %v1351_v10 = vsel %vm1349_vm8, %v1346_v3, %v4000_v44  ;;  %v1714_v3 = vld [vmem:[%s4673_s5 + $0x1b0] sm:$0xff] }
 0x21a   :  { %v1383_v28 = vsel %vm1382_vm12, %v1375_v7, %v3992_v8 }
 0x21b   :  { %v1439_v43 = vsel %vm1359_vm10, %v1435_v12, %v1383_v28  ;;  %v1706_v28 = vld [vmem:[%s4673_s5 + $0x170] sm:$0xff]  ;;  %v1708_v12 = vld [vmem:[%s4673_s5 + $0x180] sm:$0xff] }
 0x21c   :  { %v4008_v36 = vpop.permute.xlu1 %1142  ;;  %v2970_v16 = vpack.c.bf16 %v1706_v28, %v1704_v9  ;;  %v2974_v58 = vpack.c.bf16 %v1710_v55, %v1708_v12 }
 0x21d   :  { %v4010_v48 = vpop.permute.xlu0 %1302  ;;  %v1432_v46 = vsel %vm1349_vm8, %v1428_v32, %v4008_v36  ;;  %v1356_v17 = vsel %vm1354_vm9, %v1351_v10, %v4008_v36  ;;  %v1717_v32 = vld [vmem:[%s4673_s5 + $0x1c8] sm:$0xff] }
 0x21e   :  { %v1443_v19 = vsel %vm1364_vm11, %v1439_v43, %v4010_v48  ;;  %v1370_v5 = vsel %vm1369_vm6, %v1365_v37, %v4010_v48  ;;  %v1716_v37 = vld [vmem:[%s4673_s5 + $0x1c0] sm:$0xff] }
 0x220   :  { %v4012_v18 = vpop.permute.xlu1 %1154 }
 0x221   :  { %v1392_v4 = vpop.permute.xlu0 %1391  ;;  %v1436_v52 = vsel %vm1354_vm9, %v1432_v46, %v4012_v18  ;;  %v1361_v44 = vsel %vm1359_vm10, %v1356_v17, %v4012_v18  ;;  %v1701_v18 = vld [vmem:[%s4673_s5 + $0x148] sm:$0xff]  ;;  %v1718_v17 = vld [vmem:[%s4673_s5 + $0x1d0] sm:$0x3] }
 0x222   :  { %v1447_v62 = vsel %vm1369_vm6, %v1443_v19, %v1392_v4  ;;  %v2964_v29 = vpack.c.bf16 %v1703_v22, %v1701_v18  ;;  %v1712_v19 = vld [vmem:[%s4673_s5 + $0x1a0] sm:$0xff] }
 0x223   :  { %v4111_v7 = vmax.f32 %v1370_v5, %v1447_v62  ;;  %v2983_v5 = vpack.c.bf16 %v1718_v17, %v1716_v37 }
 0x224   :  { %v1293_v61 = vpop.permute.xlu1 %1292  ;;  %2965 = vmatprep.subr.bf16.mxu1 %v2964_v29 }
 0x225   :  { %v4037_v60 = vpop.permute.xlu0 %1048  ;;  %v1366_v8 = vsel %vm1364_vm11, %v1361_v44, %v1293_v61  ;;  %v1477_v48 = vrot.slane %v4111_v7, 2  ;;  %v1459_v40 = vrot.slane %v4111_v7, 1  ;;  %2967 = vmatpush1.bf16.msra.mxu1 %v2966_v27 }
 0x226   :  { %2969 = vmatprep.subr.bf16.mxu1 %v2968_v31  ;;  %v1317_v22 = vsel %vm1314_vm13, %v3691_v20, %v4037_v60 }
 0x228   :  { %v1377_v35 = vpop.permute.xlu1 %1376 }
 0x229   :  { %v4072_v54 = vpop.permute.xlu0 %1060  ;;  %v1384_v11 = vsel %vm1382_vm12, %v1377_v35, %v1293_v61  ;;  %2971 = vmatpush1.bf16.msra.mxu1 %v2970_v16 }
 0x22a   :  { %v1440_v26 = vsel %vm1359_vm10, %v1436_v52, %v1384_v11  ;;  %2973 = vmatprep.subr.bf16.mxu1 %v2972_v57  ;;  %v1719_v11 = vld [vmem:[%s4673_s5 + $0x1d8] sm:$0x3]  ;;  %v1405_v56 = vsel %vm1314_vm13, %v4037_v60, %v4072_v54 }
 0x22b   :  { %v2980_v46 = vpack.c.bf16 %v1719_v11, %v1717_v32 }
 0x22c   :  { %v1305_v42 = vpop.permute.xlu1 %1304 }
 0x22d   :  { %v4101_v49 = vpop.permute.xlu0 %1072  ;;  %v1444_v21 = vsel %vm1364_vm11, %v1440_v26, %v1305_v42  ;;  %v1371_v36 = vsel %vm1369_vm6, %v1366_v8, %v1305_v42  ;;  %2975 = vmatpush1.bf16.msra.mxu1 %v2974_v58  ;;  %v2978_v42 = vpack.c.bf16 %v1714_v3, %v1712_v19 }
 0x22e   :  { %2977 = vmatprep.subr.bf16.mxu1 %v2976_v1  ;;  %v1409_v29 = vsel %vm1319_vm14, %v1405_v56, %v4101_v49 }
 0x230   :  { %v1394_v4 = vpop.permute.xlu1 %1393 }
 0x231   :  { %v1448_v33 = vsel %vm1369_vm6, %v1444_v21, %v1394_v4  ;;  %v4118_v14 = vpop.permute.xlu0 %1084  ;;  %2979 = vmatpush1.bf16.msra.mxu1 %v2978_v42 }
 0x232   :  { %v4120_v15 = vmax.f32 %v1371_v36, %v1448_v33  ;;  %v1413_v63 = vsel %vm1324_vm15, %v1409_v29, %v4118_v14 }
 0x234   :  { %v4132_v25 = vpop.permute.xlu1 %1050  ;;  %v1478_v61 = vrot.slane %v4120_v15, 2  ;;  %v1460_v6 = vrot.slane %v4120_v15, 1 }
 0x235   :  { %v4146_v38 = vpop.permute.xlu0 %1096 }
 0x236   :  { %v1479_v59 = vsel %vm4685_vm1, %v1477_v48, %v1478_v61  ;;  %v1461_v41 = vsel %vm4684_vm0, %v1459_v40, %v1460_v6  ;;  %vm3141_vm0 = vmmov 1   ;;  %v1322_v40 = vsel %vm1319_vm14, %v1317_v22, %v4072_v54 }
 0x237   :  { %1483 = vrot.lane.b32.xlu1 %v1479_v59, %s3124_s18  ;;  %1465 = vrot.lane.b32.xlu0 %v1461_v41, %s3140_s20  ;;  %vm2981_vm1 = vmpackc.low %vm1931_vm3, %vm3141_vm0  ;;  %v1327_v23 = vsel %vm1324_vm15, %v1322_v40, %v4101_v49  ;;  %v1417_v60 = vsel %vm1329_vm2, %v1413_v63, %v4146_v38  ;;  %v1318_v54 = vsel %vm1314_vm13, %v3768_v24, %v4132_v25  ;;  %vm4686_vm0 = vcmask 1045504  }
 0x238   :  { %v1063_v35 = vpop.permute.xlu1 %1062  ;;  %2982 = vmatprep.subr.msk.bf16.mxu1 %vm2981_vm1, %v2980_v46  ;;  %v1332_v20 = vsel %vm1329_vm2, %v1327_v23, %v4118_v14 }
 0x239   :  { %v1109_v0 = vpop.permute.xlu0 %1108  ;;  %2985 = vmatpush1.bf16.msk.msra.mxu1 %vm2981_vm1, %v2983_v5  ;;  %v1406_v31 = vsel %vm1314_vm13, %v4132_v25, %v1063_v35  ;;  %v1337_v49 = vsel %vm1334_vm4, %v1332_v20, %v4146_v38  ;;  %v1323_v28 = vsel %vm1319_vm14, %v1318_v54, %v1063_v35  ;;  %vm4687_vm1 = vcmask 1046528  }
 0x23a   :  { %v1421_v9 = vsel %vm1334_vm4, %v1417_v60, %v1109_v0  ;;  %v1342_v14 = vsel %vm1339_vm5, %v1337_v49, %v1109_v0  ;;  %v3142_v20 = vmov 1966171168   ;;  %vm4688_vm13 = vcmask 228352  }
 0x23b   :  { %v1515_v60 = vunpack.c.l.s4 %v3142_v20 }
 0x23c   :  { %v1075_v43 = vpop.permute.xlu1 %1074 }
 0x23d   :  { %v1121_v2 = vpop.permute.xlu0 %1120  ;;  %v1410_v59 = vsel %vm1319_vm14, %v1406_v31, %v1075_v43  ;;  %v1328_v50 = vsel %vm1324_vm15, %v1323_v28, %v1075_v43  ;;  %v1516_v54 = vunpack.c.0.s8 %v1515_v60  ;;  %vm1924_vm14 = vcmask 867328  }
 0x23e   :  { %v1425_v41 = vsel %vm1339_vm5, %v1421_v9, %v1121_v2  ;;  %v1347_v35 = vsel %vm1344_vm7, %v1342_v14, %v1121_v2 }
 0x23f   :  { %v4280_v31 = vsub.s32 %v1516_v54, %v3372_v13 }
 0x240   :  { %v1087_v62 = vpop.permute.xlu1 %1086 }
 0x241   :  { %v1133_v10 = vpop.permute.xlu0 %1132  ;;  %v1414_v24 = vsel %vm1324_vm15, %v1410_v59, %v1087_v62  ;;  %v1333_v38 = vsel %vm1329_vm2, %v1328_v50, %v1087_v62  ;;  %vm4689_vm15 = vmmov %vm4688_vm13 }
 0x242   :  { %v1429_v34 = vsel %vm1344_vm7, %v1425_v41, %v1133_v10  ;;  %v1352_v47 = vsel %vm1349_vm8, %v1347_v35, %v1133_v10 }
 0x244   :  { %v1099_v52 = vpop.permute.xlu1 %1098 }
 0x245   :  { %v1145_v44 = vpop.permute.xlu0 %1144  ;;  %v1418_v57 = vsel %vm1329_vm2, %v1414_v24, %v1099_v52  ;;  %v1338_v0 = vsel %vm1334_vm4, %v1333_v38, %v1099_v52  ;;  %vm4690_vm2 = vmmov %vm4688_vm13 }
 0x246   :  { %v1433_v12 = vsel %vm1349_vm8, %v1429_v34, %v1145_v44  ;;  %v1357_v19 = vsel %vm1354_vm9, %v1352_v47, %v1145_v44 }
 0x248   :  { %v1111_v26 = vpop.permute.xlu1 %1110 }
 0x249   :  { %v1157_v8 = vpop.permute.xlu0 %1156  ;;  %v1422_v55 = vsel %vm1334_vm4, %v1418_v57, %v1111_v26  ;;  %v1343_v58 = vsel %vm1339_vm5, %v1338_v0, %v1111_v26  ;;  %vm4691_vm4 = vmmov %vm4690_vm2 }
 0x24a   :  { %v1437_v39 = vsel %vm1354_vm9, %v1433_v12, %v1157_v8  ;;  %v1362_v46 = vsel %vm1359_vm10, %v1357_v19, %v1157_v8 }
 0x24c   :  { %v1123_v21 = vpop.permute.xlu1 %1122 }
 0x24d   :  { %v1295_v36 = vpop.permute.xlu0 %1294  ;;  %v1426_v1 = vsel %vm1339_vm5, %v1422_v55, %v1123_v21  ;;  %v1348_v2 = vsel %vm1344_vm7, %v1343_v58, %v1123_v21  ;;  %vm2386_vm5 = vcmask 130048  }
 0x24e   :  { %v1367_v5 = vsel %vm1364_vm11, %v1362_v46, %v1295_v36 }
 0x250   :  { %v1135_v4 = vpop.permute.xlu1 %1134 }
 0x251   :  { %v1379_v48 = vpop.permute.xlu0 %1378  ;;  %v1430_v32 = vsel %vm1344_vm7, %v1426_v1, %v1135_v4  ;;  %v1353_v10 = vsel %vm1349_vm8, %v1348_v2, %v1135_v4  ;;  %vm2389_vm7 = vcmask 261120  }
 0x252   :  { %v1385_v25 = vsel %vm1382_vm12, %v1379_v48, %v1295_v36 }
 0x253   :  { %v1441_v3 = vsel %vm1359_vm10, %v1437_v39, %v1385_v25 }
 0x254   :  { %v1147_v33 = vpop.permute.xlu1 %1146 }
 0x255   :  { %v1307_v27 = vpop.permute.xlu0 %1306  ;;  %v1434_v37 = vsel %vm1349_vm8, %v1430_v32, %v1147_v33  ;;  %v1358_v52 = vsel %vm1354_vm9, %v1353_v10, %v1147_v33 }
 0x256   :  { %v1445_v11 = vsel %vm1364_vm11, %v1441_v3, %v1307_v27  ;;  %v1372_v21 = vsel %vm1369_vm6, %v1367_v5, %v1307_v27 }
 0x258   :  { %v1159_v18 = vpop.permute.xlu1 %1158 }
 0x259   :  { %v1396_v43 = vpop.permute.xlu0 %1395  ;;  %v1438_v44 = vsel %vm1354_vm9, %v1434_v37, %v1159_v18  ;;  %v1363_v26 = vsel %vm1359_vm10, %v1358_v52, %v1159_v18  ;;  %vm2394_vm9 = vcmask 523264  }
 0x25a   :  { %v1449_v17 = vsel %vm1369_vm6, %v1445_v11, %v1396_v43 }
 0x25b   :  { %v1453_v22 = vmax.f32 %v1372_v21, %v1449_v17 }
 0x25c   :  { %v1297_v30 = vpop.permute.xlu1 %1296 }
 0x25d   :  { %v1368_v4 = vsel %vm1364_vm11, %v1363_v26, %v1297_v30  ;;  %v1480_v36 = vrot.slane %v1453_v22, 2  ;;  %v1462_v18 = vrot.slane %v1453_v22, 1 }
 0x260   :  { %v1381_v16 = vpop.permute.xlu1 %1380 }
 0x261   :  { %v1386_v62 = vsel %vm1382_vm12, %v1381_v16, %v1297_v30 }
 0x262   :  { %v1442_v48 = vsel %vm1359_vm10, %v1438_v44, %v1386_v62  ;;  %vm4692_vm10 = vcmask 1041409  }
 0x264   :  { %v1309_v42 = vpop.permute.xlu1 %1308 }
 0x265   :  { %v1446_v8 = vsel %vm1364_vm11, %v1442_v48, %v1309_v42  ;;  %v1373_v40 = vsel %vm1369_vm6, %v1368_v4, %v1309_v42  ;;  %vm4693_vm11 = vmmov %vm4692_vm10 }
 0x268   :  { %v1398_v56 = vpop.permute.xlu1 %1397 }
 0x269   :  { %v1450_v33 = vsel %vm1369_vm6, %v1446_v8, %v1398_v56  ;;  %vm1495_vm6 = vcmask 637952  }
 0x26a   :  { %v4263_v29 = vmax.f32 %v1373_v40, %v1450_v33 }
 0x26c   :  { %v1481_v23 = vrot.slane %v4263_v29, 2  ;;  %v1463_v63 = vrot.slane %v4263_v29, 1 }
 0x26e   :  { %v1482_v27 = vsel %vm4686_vm0, %v1480_v36, %v1481_v23  ;;  %v1464_v30 = vsel %vm4687_vm1, %v1462_v18, %v1463_v63  ;;  %vm2450_vm1 = vcmask 916480  }
 0x26f   :  { %1487 = vrot.lane.b32.xlu1 %v1482_v27, %s3124_s18  ;;  %1469 = vrot.lane.b32.xlu0 %v1464_v30, %s3140_s20 }
 0x273   :  { %1485 = vrot.lane.b32.xlu1 %v1478_v61, %s3124_s18  ;;  %1467 = vrot.lane.b32.xlu0 %v1460_v6, %s3140_s20 }
 0x277   :  { %1489 = vrot.lane.b32.xlu1 %v1481_v23, %s3124_s18  ;;  %1471 = vrot.lane.b32.xlu0 %v1463_v63, %s3140_s20 }
 0x2a9   :  { %v1484_v49 = vpop.permute.xlu1 %1483  ;;  %v1466_v9 = vpop.permute.xlu0 %1465 }
 0x2aa   :  { %v1496_v61 = vsel %vm1495_vm6, %v4111_v7, %v1466_v9  ;;  %v1500_v28 = vsel %vm4688_vm13, %v1466_v9, %v1484_v49  ;;  %vm3149_vm13 = vmmov 0  }
 0x2ab   :  { %v1512_v59 = vcombine.low %v1496_v61, %v1500_v28  ;;  %v1513_v6 = vcombine.high %v1496_v61, %v1500_v28 }
 0x2ad   :  { %v1520_v14 = vrot.slane %v1512_v59, %v4280_v31  ;;  %v1527_v41 = vrot.slane %v1513_v6, %v4280_v31 }
 0x2af   :  { %v1528_v50 = vcombine.high %v1520_v14, %v1520_v14  ;;  %v1529_v24 = vcombine.high %v1527_v41, %v1527_v41  ;;  %v1536_v34 = vrot.slane %v1520_v14, %v4280_v31  ;;  %v1543_v13 = vrot.slane %v1527_v41, %v4280_v31 }
 0x2b1   :  { %v1550_v25 = vrot.slane %v1528_v50, %v4280_v31  ;;  %v1557_v16 = vrot.slane %v1529_v24, %v4280_v31 }
 0x2b3   :  { %v1732_v38 = vcombine.low %v1536_v34, %v1550_v25  ;;  %v2807_v7 = vcombine.high %v1536_v34, %v1550_v25  ;;  %v1734_v57 = vcombine.low %v1543_v13, %v1557_v16  ;;  %v2808_v35 = vcombine.high %v1543_v13, %v1557_v16 }
 0x2b5   :  { %v1742_v12 = vrot.slane %v1732_v38, %v4280_v31  ;;  %v1749_v0 = vrot.slane %v2807_v7, %v4280_v31  ;;  %v1756_v55 = vrot.slane %v1734_v57, %v4280_v31  ;;  %v1763_v47 = vrot.slane %v2808_v35, %v4280_v31 }
 0x2b7   :  { %v1765_v39 = vcombine.high %v1742_v12, %v1749_v0  ;;  %v1767_v43 = vcombine.high %v1756_v55, %v1763_v47  ;;  %v1764_v58 = vcombine.low %v1742_v12, %v1749_v0  ;;  %v1766_v1 = vcombine.low %v1756_v55, %v1763_v47 }
 0x2b9   :  { %v1781_v19 = vrot.slane %v1765_v39, %v4280_v31  ;;  %v1795_v3 = vrot.slane %v1767_v43, %v4280_v31  ;;  %v1774_v2 = vrot.slane %v1764_v58, %v4280_v31  ;;  %v1788_v32 = vrot.slane %v1766_v1, %v4280_v31 }
 0x2bb   :  { %v1797_v11 = vcombine.low %v1781_v19, %v1795_v3  ;;  %v1796_v62 = vcombine.low %v1774_v2, %v1788_v32 }
 0x2bd   :  { %2811 = vmatprep.mubr.msk.f32.mxu1 %vm1924_vm14, %v1797_v11 }
 0x2be   :  { %2003 = vmatmul.mubr.f32.vlgmr.msra.gmra.mrb[0].mxu1 %v1796_v62 }
 0x2e1   :  { %v1488_v42 = vpop.permute.xlu1 %1487  ;;  %v1470_v10 = vpop.permute.xlu0 %1469 }
 0x2e2   :  { %v1498_v46 = vsel %vm1495_vm6, %v1453_v22, %v1470_v10  ;;  %v1502_v37 = vsel %vm4689_vm15, %v1470_v10, %v1488_v42 }
 0x2e3   :  { %v1586_v17 = vcombine.low %v1498_v46, %v1502_v37  ;;  %v1587_v52 = vcombine.high %v1498_v46, %v1502_v37 }
 0x2e5   :  { %v1594_v5 = vrot.slane %v1586_v17, %v4280_v31  ;;  %v1601_v44 = vrot.slane %v1587_v52, %v4280_v31  ;;  %v1486_v26 = vpop.permute.xlu1 %1485  ;;  %v1468_v21 = vpop.permute.xlu0 %1467 }
 0x2e6   :  { %v1497_v48 = vsel %vm1495_vm6, %v4120_v15, %v1468_v21  ;;  %v1501_v4 = vsel %vm4690_vm2, %v1468_v21, %v1486_v26 }
 0x2e7   :  { %v1602_v8 = vcombine.high %v1594_v5, %v1594_v5  ;;  %v1610_v56 = vrot.slane %v1594_v5, %v4280_v31  ;;  %v1562_v40 = vcombine.low %v1497_v48, %v1501_v4  ;;  %v1603_v22 = vcombine.high %v1601_v44, %v1601_v44  ;;  %v1720_v4 = vld [vmem:[%s4674_s6] sm:$0x3]  ;;  %s3143_s6 = smov 112  }
 0x2e8   :  { %v1617_v33 = vrot.slane %v1601_v44, %v4280_v31 }
 0x2e9   :  { %v1624_v36 = vrot.slane %v1602_v8, %v4280_v31  ;;  %v1632_v23 = vcombine.high %v1610_v56, %v1610_v56  ;;  %v1490_v18 = vpop.permute.xlu1 %1489  ;;  %v1472_v63 = vpop.permute.xlu0 %1471  ;;  %v1569_v27 = vrot.slane %v1562_v40, %v4280_v31  ;;  %v1631_v61 = vrot.slane %v1603_v22, %v4280_v31 }
 0x2ea   :  { %v1499_v30 = vsel %vm1495_vm6, %v4263_v29, %v1472_v63  ;;  %v1503_v15 = vsel %vm4691_vm4, %v1472_v63, %v1490_v18  ;;  %v1633_v28 = vcombine.high %v1617_v33, %v1617_v33  ;;  %v1725_v8 = vrot.slane %v1720_v4, %v3442_v51 }
 0x2eb   :  { %v1634_v20 = vcombine.high %v1624_v36, %v1624_v36  ;;  %v1800_v60 = vcombine.low %v1624_v36, %v1632_v23  ;;  %v1570_v54 = vcombine.high %v1569_v27, %v1569_v27  ;;  %v1577_v49 = vrot.slane %v1569_v27, %v4280_v31 }
 0x2ec   :  { %v1636_v9 = vcombine.low %v1499_v30, %v1503_v15  ;;  %v1864_v16 = vcombine.low %v1631_v61, %v1633_v28  ;;  %v1635_v38 = vcombine.high %v1631_v61, %v1631_v61  ;;  %v1729_v40 = vrot.slane %v1720_v4, %v3448_v53 }
 0x2ed   :  { %v1801_v59 = vcombine.low %v1634_v20, %v1617_v33  ;;  %v1584_v6 = vrot.slane %v1570_v54, %v4280_v31  ;;  %v1585_v14 = vcombine.high %v1577_v49, %v1577_v49  ;;  %v1822_v50 = vrot.slane %v1800_v60, %v4280_v31  ;;  %v2045_v33 = vld [vmem:[%s4676_s8] sm:$0x3]  ;;  %s3145_s8 = smov 64  }
 0x2ee   :  { %v1643_v41 = vrot.slane %v1636_v9, %v4280_v31  ;;  %v1873_v1 = vrot.slane %v1864_v16, %v4280_v31  ;;  %v2050_v15 = vrot.slane %v2045_v33, %v3442_v51  ;;  %v2054_v60 = vrot.slane %v2045_v33, %v3448_v53 }
 0x2ef   :  { %v1829_v29 = vrot.slane %v1801_v59, %v4280_v31  ;;  %v1798_v24 = vcombine.low %v1577_v49, %v1584_v6  ;;  %v1799_v34 = vcombine.low %v1585_v14, %v1610_v56  ;;  %v2027_v56 = vld [vmem:[%s4675_s7] sm:$0x3]  ;;  %s3144_s7 = smov 96   ;;  %vm2447_vm6 = vcmask 654336  }
 0x2f0   :  { %v1644_v13 = vcombine.high %v1643_v41, %v1643_v41  ;;  %v1651_v25 = vrot.slane %v1643_v41, %v4280_v31  ;;  %v2032_v23 = vrot.slane %v2027_v56, %v3442_v51  ;;  %v2036_v27 = vrot.slane %v2027_v56, %v3448_v53 }
 0x2f1   :  { %v1833_v7 = vcombine.high %v1822_v50, %v1829_v29  ;;  %v1832_v57 = vcombine.low %v1822_v50, %v1829_v29  ;;  %v1808_v35 = vrot.slane %v1798_v24, %v4280_v31  ;;  %v1815_v12 = vrot.slane %v1799_v34, %v4280_v31 }
 0x2f2   :  { %v1658_v0 = vrot.slane %v1644_v13, %v4280_v31  ;;  %v1659_v55 = vcombine.high %v1651_v25, %v1651_v25  ;;  %v1865_v47 = vcombine.low %v1635_v38, %v1651_v25 }
 0x2f3   :  { %v1831_v43 = vcombine.high %v1808_v35, %v1815_v12  ;;  %v1830_v58 = vcombine.low %v1808_v35, %v1815_v12  ;;  %v1861_v3 = vrot.slane %v1833_v7, %v4280_v31  ;;  %v1854_v62 = vrot.slane %v1832_v57, %v4280_v31 }
 0x2f4   :  { %v1866_v39 = vcombine.low %v1658_v0, %v1659_v55  ;;  %v1880_v19 = vrot.slane %v1865_v47, %v4280_v31 }
 0x2f5   :  { %v1847_v32 = vrot.slane %v1831_v43, %v4280_v31  ;;  %v1840_v11 = vrot.slane %v1830_v58, %v4280_v31 }
 0x2f6   :  { %v1887_v2 = vrot.slane %v1866_v39, %v4280_v31  ;;  %v1889_v42 = vcombine.high %v1873_v1, %v1880_v19  ;;  %v1888_v10 = vcombine.low %v1873_v1, %v1880_v19 }
 0x2f7   :  { %v1863_v46 = vcombine.low %v1847_v32, %v1861_v3  ;;  %v1862_v37 = vcombine.low %v1840_v11, %v1854_v62 }
 0x2f8   :  { %v1890_v17 = vcombine.high %v1887_v2, %v1887_v2  ;;  %v1897_v52 = vrot.slane %v1888_v10, %v4280_v31  ;;  %v1911_v5 = vrot.slane %v1887_v2, %v4280_v31  ;;  %v1904_v44 = vrot.slane %v1889_v42, %v4280_v31 }
 0x2f9   :  { %2812 = vmatprep.mubr.msk.f32.mxu1 %vm1924_vm14, %v1863_v46 }
 0x2fa   :  { %v1918_v26 = vrot.slane %v1890_v17, %v4280_v31  ;;  %2009 = vmatmul.mubr.f32.gmra.mrb[2].mxu1 %v1862_v37  ;;  %v1919_v48 = vcombine.low %v1897_v52, %v1911_v5 }
 0x2fc   :  { %v1920_v21 = vcombine.low %v1904_v44, %v1918_v26 }
 0x2fe   :  { %2813 = vmatprep.mubr.msk.f32.mxu1 %vm1924_vm14, %v1920_v21 }
 0x2ff   :  { %2015 = vmatmul.mubr.f32.gmra.mrb[4].mxu1 %v1919_v48 }
 0x300   :  { %2901 = vmatprep.mubr.msk.f32.mxu1 %vm3149_vm13, %v3126_v45 }
 0x391   :  { %v2004_v22 = vpop.f32.mrb[0].mxu1 }
 0x392   :  { %v2005_v36 = vadd.f32 %v2004_v22, %v1725_v8  ;;  %v2006_v18 = vpop.f32.mrb[1].mxu1 }
 0x393   :  { %v2007_v63 = vadd.f32 %v2006_v18, %v1729_v40 }
 0x394   :  { %v2021_v30 = vmax.f32 %v2005_v36, 0.0 }
 0x395   :  { %v2022_v20 = vmax.f32 %v2007_v63, 0.0 }
 0x396   :  { %v2039_v54 = vmul.f32 %v2032_v23, %v2021_v30 }
 0x397   :  { %v2040_v49 = vmul.f32 %v2036_v27, %v2022_v20 }
 0x398   :  { %v2057_v9 = vadd.f32 %v2050_v15, %v2039_v54 }
 0x399   :  { %v2058_v61 = vadd.f32 %v2054_v60, %v2040_v49 }
 0x39b   :  { %v2069_v28 = vcombine.low %v2057_v9, %v2058_v61  ;;  %v2070_v59 = vcombine.high %v2057_v9, %v2058_v61 }
 0x39d   :  { %v2077_v6 = vrot.slane %v2069_v28, %v4280_v31  ;;  %v2084_v14 = vrot.slane %v2070_v59, %v4280_v31 }
 0x39f   :  { %v2085_v41 = vcombine.high %v2077_v6, %v2077_v6  ;;  %v2086_v50 = vcombine.high %v2084_v14, %v2084_v14  ;;  %v2093_v29 = vrot.slane %v2077_v6, %v4280_v31  ;;  %v2100_v24 = vrot.slane %v2084_v14, %v4280_v31 }
 0x3a1   :  { %v2107_v51 = vrot.slane %v2085_v41, %v4280_v31  ;;  %v2114_v53 = vrot.slane %v2086_v50, %v4280_v31  ;;  %v2115_v34 = vcombine.high %v2093_v29, %v2093_v29  ;;  %v2116_v13 = vcombine.high %v2100_v24, %v2100_v24 }
 0x3a3   :  { %v2117_v25 = vcombine.high %v2107_v51, %v2107_v51  ;;  %v2118_v16 = vcombine.high %v2114_v53, %v2114_v53  ;;  %v2228_v38 = vmax.f32 %v2093_v29, %v2107_v51  ;;  %v2230_v57 = vmax.f32 %v2100_v24, %v2114_v53 }
 0x3a5   :  { %v2229_v7 = vmax.f32 %v2115_v34, %v2117_v25  ;;  %v2231_v35 = vmax.f32 %v2116_v13, %v2118_v16 }
 0x3a7   :  { %v2248_v12 = vcombine.low %v2228_v38, %v2229_v7  ;;  %v2249_v0 = vcombine.low %v2230_v57, %v2231_v35 }
 0x3a9   :  { %v2256_v55 = vrot.slane %v2248_v12, %v4280_v31  ;;  %v2263_v47 = vrot.slane %v2249_v0, %v4280_v31 }
 0x3ab   :  { %v2271_v39 = vcombine.low %v2256_v55, %v2263_v47  ;;  %v2346_v43 = vcombine.high %v2256_v55, %v2263_v47 }
 0x3ad   :  { %v2278_v53 = vrot.slane %v2271_v39, %v4280_v31  ;;  %v2354_v57 = vrot.slane %v2346_v43, %v4280_v31 }
 0x3cd   :  { %v2010_v58 = vpop.f32.mrb[2].mxu1 }
 0x3ce   :  { %v2011_v1 = vadd.f32 %v2010_v58, %v1725_v8  ;;  %v2012_v19 = vpop.f32.mrb[3].mxu1 }
 0x3cf   :  { %v2013_v3 = vadd.f32 %v2012_v19, %v1729_v40 }
 0x3d0   :  { %v2023_v2 = vmax.f32 %v2011_v1, 0.0 }
 0x3d1   :  { %v2024_v32 = vmax.f32 %v2013_v3, 0.0 }
 0x3d2   :  { %v2016_v11 = vpop.f32.mrb[4].mxu1  ;;  %v2041_v62 = vmul.f32 %v2032_v23, %v2023_v2 }
 0x3d3   :  { %v2017_v42 = vadd.f32 %v2016_v11, %v1725_v8  ;;  %v2018_v10 = vpop.f32.mrb[5].mxu1  ;;  %v2042_v46 = vmul.f32 %v2036_v27, %v2024_v32 }
 0x3d4   :  { %v2019_v37 = vadd.f32 %v2018_v10, %v1729_v40  ;;  %v2059_v17 = vadd.f32 %v2050_v15, %v2041_v62  ;;  %v2470_v10 = vld [vmem:[%s4677_s9 + $0x88] sm:$0xff] }
 0x3d5   :  { %v2025_v52 = vmax.f32 %v2017_v42, 0.0  ;;  %v2060_v5 = vadd.f32 %v2054_v60, %v2042_v46  ;;  %v2453_v46 = vld [vmem:[%s4677_s9] sm:$0xff] }
 0x3d6   :  { %v2026_v44 = vmax.f32 %v2019_v37, 0.0 }
 0x3d7   :  { %v2043_v26 = vmul.f32 %v2032_v23, %v2025_v52  ;;  %v2119_v21 = vcombine.low %v2059_v17, %v2060_v5  ;;  %v2120_v48 = vcombine.high %v2059_v17, %v2060_v5  ;;  %v2454_v17 = vld [vmem:[%s4677_s9 + $0x8] sm:$0xff]  ;;  %v2471_v52 = vld [vmem:[%s4677_s9 + $0x90] sm:$0xff]  ;;  %v2472_v5 = vld [vmem:[%s4677_s9 + $0x98] sm:$0xff] }
 0x3d8   :  { %v2044_v4 = vmul.f32 %v2036_v27, %v2026_v44  ;;  %v2988_v44 = vpack.c.bf16 %v2454_v17, %v2453_v46 }
 0x3d9   :  { %v2061_v56 = vadd.f32 %v2050_v15, %v2043_v26  ;;  %v2127_v22 = vrot.slane %v2119_v21, %v4280_v31  ;;  %v2134_v33 = vrot.slane %v2120_v48, %v4280_v31  ;;  %v2990_v26 = vpack.c.bf16 %v2472_v5, %v2471_v52  ;;  %v2455_v21 = vld [vmem:[%s4677_s9 + $0x10] sm:$0xff]  ;;  %v2456_v48 = vld [vmem:[%s4677_s9 + $0x18] sm:$0xff] }
 0x3da   :  { %v2062_v36 = vadd.f32 %v2054_v60, %v2044_v4  ;;  %v2473_v4 = vld [vmem:[%s4677_s9 + $0xa0] sm:$0xff]  ;;  %v3147_v52 = vmov 0.0|0.0  }
 0x3db   :  { %v2135_v18 = vcombine.high %v2127_v22, %v2127_v22  ;;  %v2136_v63 = vcombine.high %v2134_v33, %v2134_v33  ;;  %v2150_v8 = vrot.slane %v2134_v33, %v4280_v31  ;;  %v2143_v20 = vrot.slane %v2127_v22, %v4280_v31  ;;  %3045 = vmatprep.subr.bf16.mxu1 %v3147_v52 }
 0x3dc   :  { %v2168_v30 = vcombine.low %v2061_v56, %v2062_v36  ;;  %v2169_v40 = vcombine.high %v2061_v56, %v2062_v36  ;;  %v2474_v56 = vld [vmem:[%s4677_s9 + $0xa8] sm:$0xff]  ;;  %v2992_v22 = vpack.c.bf16 %v2456_v48, %v2455_v21  ;;  %v2457_v36 = vld [vmem:[%s4677_s9 + $0x20] sm:$0xff] }
 0x3dd   :  { %v2157_v54 = vrot.slane %v2135_v18, %v4280_v31  ;;  %v2164_v23 = vrot.slane %v2136_v63, %v4280_v31  ;;  %v2165_v49 = vcombine.high %v2150_v8, %v2150_v8  ;;  %v2994_v33 = vpack.c.bf16 %v2474_v56, %v2473_v4  ;;  %v2458_v18 = vld [vmem:[%s4677_s9 + $0x28] sm:$0xff]  ;;  %v2475_v63 = vld [vmem:[%s4677_s9 + $0xb0] sm:$0xff] }
 0x3de   :  { %v2176_v27 = vrot.slane %v2168_v30, %v4280_v31  ;;  %v2183_v60 = vrot.slane %v2169_v40, %v4280_v31  ;;  %v2996_v30 = vpack.c.bf16 %v2458_v18, %v2457_v36 }
 0x3df   :  { %v2166_v15 = vcombine.high %v2157_v54, %v2157_v54  ;;  %v2232_v9 = vmax.f32 %v2143_v20, %v2157_v54  ;;  %v2167_v61 = vcombine.high %v2164_v23, %v2164_v23  ;;  %v2234_v14 = vmax.f32 %v2164_v23, %v2165_v49  ;;  %v2459_v20 = vld [vmem:[%s4677_s9 + $0x30] sm:$0xff]  ;;  %v2460_v54 = vld [vmem:[%s4677_s9 + $0x38] sm:$0xff]  ;;  %v2477_v23 = vld [vmem:[%s4677_s9 + $0xc0] sm:$0xff] }
 0x3e0   :  { %v2184_v28 = vcombine.high %v2176_v27, %v2176_v27  ;;  %v2191_v59 = vrot.slane %v2176_v27, %v4280_v31  ;;  %v2198_v25 = vrot.slane %v2183_v60, %v4280_v31  ;;  %v2478_v49 = vld [vmem:[%s4677_s9 + $0xc8] sm:$0xff]  ;;  %v3000_v27 = vpack.c.bf16 %v2460_v54, %v2459_v20  ;;  %v2479_v60 = vld [vmem:[%s4677_s9 + $0xd0] sm:$0xff] }
 0x3e1   :  { %v2233_v6 = vmax.f32 %v2166_v15, %v2150_v8  ;;  %v2270_v41 = vrot.slane %v2232_v9, %v4280_v31  ;;  %v2476_v8 = vld [vmem:[%s4677_s9 + $0xb8] sm:$0xff]  ;;  %v3002_v15 = vpack.c.bf16 %v2478_v49, %v2477_v23  ;;  %v2461_v9 = vld [vmem:[%s4677_s9 + $0x40] sm:$0xff] }
 0x3e2   :  { %v2205_v50 = vrot.slane %v2184_v28, %v4280_v31  ;;  %v2206_v29 = vcombine.high %v2191_v59, %v2191_v59  ;;  %v2235_v24 = vmax.f32 %v2167_v61, %v2191_v59  ;;  %v2998_v40 = vpack.c.bf16 %v2476_v8, %v2475_v63  ;;  %v2462_v61 = vld [vmem:[%s4677_s9 + $0x48] sm:$0xff]  ;;  %v2480_v28 = vld [vmem:[%s4677_s9 + $0xd8] sm:$0xff] }
 0x3e3   :  { %v2287_v51 = vcombine.low %v2233_v6, %v2234_v14  ;;  %v2285_v34 = vrot.slane %v2270_v41, %v4280_v31  ;;  %v2347_v13 = vcombine.high %v2270_v41, %v2270_v41  ;;  %v3004_v59 = vpack.c.bf16 %v2462_v61, %v2461_v9  ;;  %v2463_v14 = vld [vmem:[%s4677_s9 + $0x50] sm:$0xff]  ;;  %v2464_v41 = vld [vmem:[%s4677_s9 + $0x58] sm:$0xff] }
 0x3e4   :  { %v2207_v16 = vcombine.high %v2205_v50, %v2205_v50  ;;  %v2236_v38 = vmax.f32 %v2205_v50, %v2206_v29  ;;  %v3006_v6 = vpack.c.bf16 %v2480_v28, %v2479_v60  ;;  %v2481_v50 = vld [vmem:[%s4677_s9 + $0xe0] sm:$0xff]  ;;  %v2482_v29 = vld [vmem:[%s4677_s9 + $0xe8] sm:$0xff] }
 0x3e5   :  { %v4374_v7 = vcombine.low %v2278_v53, %v2285_v34  ;;  %v2361_v35 = vrot.slane %v2347_v13, %v4280_v31  ;;  %v2295_v47 = vrot.slane %v2287_v51, %v4280_v31  ;;  %v3010_v51 = vpack.c.bf16 %v2482_v29, %v2481_v50  ;;  %v2465_v53 = vld [vmem:[%s4677_s9 + $0x60] sm:$0xff]  ;;  %v2466_v34 = vld [vmem:[%s4677_s9 + $0x68] sm:$0xff] }
 0x3e6   :  { %v2237_v12 = vmax.f32 %v2207_v16, %v2198_v25  ;;  %v2288_v0 = vcombine.low %v2235_v24, %v2236_v38  ;;  %v3008_v24 = vpack.c.bf16 %v2464_v41, %v2463_v14  ;;  %v3012_v13 = vpack.c.bf16 %v2466_v34, %v2465_v53  ;;  %v2485_v28 = vld [vmem:[%s4677_s9 + $0x100] sm:$0xff] }
 0x3e7   :  { %2328 = vrot.lane.b32.xlu0 %v4374_v7, %s3143_s6  ;;  %v2362_v55 = vcombine.low %v2354_v57, %v2361_v35 }
 0x3e8   :  { %v2302_v39 = vrot.slane %v2288_v0, %v4280_v31  ;;  %v2309_v58 = vrot.slane %v2237_v12, %v4280_v31 }
 0x3ea   :  { %v2310_v1 = vcombine.low %v2295_v47, %v2302_v39  ;;  %v2363_v19 = vcombine.high %v2295_v47, %v2302_v39  ;;  %v2364_v3 = vcombine.high %v2309_v58, %v2309_v58  ;;  %v2324_v2 = vrot.slane %v2309_v58, %v4280_v31 }
 0x3eb   :  { %2334 = vrot.lane.b32.xlu0 %v4374_v7, %s3144_s7 }
 0x3ec   :  { %v2317_v43 = vrot.slane %v2310_v1, %v4280_v31  ;;  %v2371_v32 = vrot.slane %v2363_v19, %v4280_v31  ;;  %v2378_v11 = vrot.slane %v2364_v3, %v4280_v31  ;;  %v2469_v31 = vld [vmem:[%s4677_s9 + $0x80] sm:$0xff]  ;;  %v2483_v1 = vld [vmem:[%s4677_s9 + $0xf0] sm:$0xff]  ;;  %v2484_v19 = vld [vmem:[%s4677_s9 + $0xf8] sm:$0xff] }
 0x3ed   :  { %v2986_v37 = vpack.c.bf16 %v2470_v10, %v2469_v31 }
 0x3ee   :  { %v4388_v62 = vcombine.low %v2317_v43, %v2324_v2  ;;  %v2379_v42 = vcombine.low %v2371_v32, %v2378_v11  ;;  %v3014_v43 = vpack.c.bf16 %v2484_v19, %v2483_v1  ;;  %v2467_v11 = vld [vmem:[%s4677_s9 + $0x70] sm:$0xff]  ;;  %v2497_v19 = vld [vmem:[%s4677_s9 + $0x160] sm:$0xff] }
 0x3ef   :  { %2340 = vrot.lane.b32.xlu0 %v4374_v7, %s3135_s15  ;;  %2987 = vmatprep.subr.bf16.mxu0 %v2986_v37 }
 0x3f0   :  { %2330 = vrot.lane.b32.xlu1 %v4388_v62, %s3143_s6  ;;  %2989 = vmatpush3.bf16.msra.mxu0 %v2988_v44 }
 0x3f1   :  { %2991 = vmatprep.subr.bf16.mxu0 %v2990_v26 }
 0x3f3   :  { %2397 = vrot.lane.b32.xlu0 %v4374_v7, %s3145_s8 }
 0x3f4   :  { %2336 = vrot.lane.b32.xlu1 %v4388_v62, %s3144_s7  ;;  %2993 = vmatpush3.bf16.msra.mxu0 %v2992_v22 }
 0x3f5   :  { %2995 = vmatprep.subr.bf16.mxu0 %v2994_v33 }
 0x3f7   :  { %2380 = vrot.lane.b32.xlu0 %v2362_v55, %s3145_s8 }
 0x3f8   :  { %2342 = vrot.lane.b32.xlu1 %v4388_v62, %s3135_s15  ;;  %2997 = vmatpush3.bf16.msra.mxu0 %v2996_v30 }
 0x3f9   :  { %2999 = vmatprep.subr.bf16.mxu0 %v2998_v40 }
 0x3fb   :  { %2403 = vrot.lane.b32.xlu0 %v2362_v55, %s3146_s25 }
 0x3fc   :  { %2399 = vrot.lane.b32.xlu1 %v4388_v62, %s3145_s8  ;;  %3001 = vmatpush3.bf16.msra.mxu0 %v3000_v27 }
 0x3fd   :  { %3003 = vmatprep.subr.bf16.mxu0 %v3002_v15 }
 0x400   :  { %2382 = vrot.lane.b32.xlu1 %v2379_v42, %s3145_s8  ;;  %3005 = vmatpush3.bf16.msra.mxu0 %v3004_v59  ;;  %v2486_v59 = vld [vmem:[%s4677_s9 + $0x108] sm:$0xff] }
 0x401   :  { %3007 = vmatprep.subr.bf16.mxu0 %v3006_v6  ;;  %v3019_v50 = vpack.c.bf16 %v2486_v59, %v2485_v28 }
 0x404   :  { %2405 = vrot.lane.b32.xlu1 %v2379_v42, %s3146_s25  ;;  %3009 = vmatpush3.bf16.msra.mxu0 %v3008_v24  ;;  %v2468_v42 = vld [vmem:[%s4677_s9 + $0x78] sm:$0xff]  ;;  %v2487_v24 = vld [vmem:[%s4677_s9 + $0x110] sm:$0xff] }
 0x405   :  { %3011 = vmatprep.subr.bf16.mxu0 %v3010_v51  ;;  %v2488_v51 = vld [vmem:[%s4677_s9 + $0x118] sm:$0xff] }
 0x408   :  { %3013 = vmatpush3.bf16.msra.mxu0 %v3012_v13  ;;  %v3022_v13 = vpack.c.bf16 %v2488_v51, %v2487_v24 }
 0x409   :  { %3015 = vmatprep.subr.bf16.mxu0 %v3014_v43 }
 0x459   :  { %v2329_v25 = vpop.permute.xlu0 %2328 }
 0x45a   :  { %v2387_v2 = vsel %vm2386_vm5, %v4374_v7, %v2329_v25  ;;  %v3016_v7 = vpack.c.bf16 %v2468_v42, %v2467_v11  ;;  %v2501_v42 = vld [vmem:[%s4677_s9 + $0x180] sm:$0xff] }
 0x45c   :  { %3017 = vmatpush3.bf16.msra.mxu0 %v3016_v7  ;;  %v2654_v7 = vld [vmem:[%s4679_s11 + $0x8] sm:$0xff] }
 0x45d   :  { %v2335_v16 = vpop.permute.xlu0 %2334  ;;  %3018 = vmatprep.subr.bf16.mxu0 %v3147_v52 }
 0x45e   :  { %v2409_v47 = vsel %vm2386_vm5, %v2329_v25, %v2335_v16  ;;  %v2390_v31 = vsel %vm2389_vm7, %v2387_v2, %v2335_v16  ;;  %v2489_v25 = vld [vmem:[%s4677_s9 + $0x120] sm:$0xff]  ;;  %v2490_v16 = vld [vmem:[%s4677_s9 + $0x128] sm:$0xff]  ;;  %v2499_v2 = vld [vmem:[%s4677_s9 + $0x170] sm:$0xff] }
 0x461   :  { %v2341_v38 = vpop.permute.xlu0 %2340 }
 0x462   :  { %v2331_v57 = vpop.permute.xlu1 %2330  ;;  %v2411_v3 = vsel %vm2389_vm7, %v2409_v47, %v2341_v38  ;;  %v2392_v46 = vsel %vm1349_vm8, %v2390_v31, %v2341_v38  ;;  %v3025_v38 = vpack.c.bf16 %v2490_v16, %v2489_v25  ;;  %v2502_v31 = vld [vmem:[%s4677_s9 + $0x188] sm:$0xff] }
 0x463   :  { %v2388_v5 = vsel %vm2386_vm5, %v4388_v62, %v2331_v57 }
 0x465   :  { %v2398_v35 = vpop.permute.xlu0 %2397 }
 0x466   :  { %v2337_v12 = vpop.permute.xlu1 %2336  ;;  %v2413_v32 = vsel %vm1349_vm8, %v2411_v3, %v2398_v35  ;;  %v2492_v35 = vld [vmem:[%s4677_s9 + $0x138] sm:$0xff]  ;;  %v2498_v3 = vld [vmem:[%s4677_s9 + $0x168] sm:$0xff] }
 0x467   :  { %v2410_v44 = vsel %vm2386_vm5, %v2331_v57, %v2337_v12  ;;  %v2391_v21 = vsel %vm2389_vm7, %v2388_v5, %v2337_v12  ;;  %v2491_v57 = vld [vmem:[%s4677_s9 + $0x130] sm:$0xff]  ;;  %v3037_v43 = vpack.c.bf16 %v2498_v3, %v2497_v19 }
 0x468   :  { %v3028_v12 = vpack.c.bf16 %v2492_v35, %v2491_v57 }
 0x469   :  { %v2381_v0 = vpop.permute.xlu0 %2380 }
 0x46a   :  { %v2343_v55 = vpop.permute.xlu1 %2342  ;;  %v2395_v17 = vsel %vm2394_vm9, %v2392_v46, %v2381_v0  ;;  %v2493_v0 = vld [vmem:[%s4677_s9 + $0x140] sm:$0xff] }
 0x46b   :  { %v2412_v48 = vsel %vm2389_vm7, %v2410_v44, %v2343_v55  ;;  %v2393_v4 = vsel %vm1349_vm8, %v2391_v21, %v2343_v55  ;;  %v2494_v55 = vld [vmem:[%s4677_s9 + $0x148] sm:$0xff]  ;;  %v2656_v44 = vld [vmem:[%s4679_s11 + $0x18] sm:$0xff]  ;;  %v2657_v21 = vld [vmem:[%s4679_s11 + $0x20] sm:$0xff] }
 0x46c   :  { %v3031_v47 = vpack.c.bf16 %v2494_v55, %v2493_v0 }
 0x46d   :  { %v2404_v58 = vpop.permute.xlu0 %2403 }
 0x46e   :  { %v2400_v39 = vpop.permute.xlu1 %2399  ;;  %v2415_v10 = vsel %vm2394_vm9, %v2413_v32, %v2404_v58  ;;  %v2496_v58 = vld [vmem:[%s4677_s9 + $0x158] sm:$0xff] }
 0x46f   :  { %v2417_v26 = vmax.f32 %v2395_v17, %v2415_v10  ;;  %v2414_v56 = vsel %vm1349_vm8, %v2412_v48, %v2400_v39  ;;  %vm4694_vm8 = vmmov %vm4692_vm10  ;;  %v2495_v39 = vld [vmem:[%s4677_s9 + $0x150] sm:$0xff]  ;;  %v2500_v32 = vld [vmem:[%s4677_s9 + $0x178] sm:$0xff]  ;;  %v3043_v10 = vpack.c.bf16 %v2502_v31, %v2501_v42 }
 0x470   :  { %vm4695_vm12 = vmmov %vm4694_vm8  ;;  %v3034_v1 = vpack.c.bf16 %v2496_v58, %v2495_v39  ;;  %v3040_v11 = vpack.c.bf16 %v2500_v32, %v2499_v2  ;;  %v2655_v17 = vld [vmem:[%s4679_s11 + $0x10] sm:$0xff]  ;;  %v2658_v48 = vld [vmem:[%s4679_s11 + $0x28] sm:$0xff] }
 0x471   :  { %v2424_v18 = vrot.slane %v2417_v26, 1  ;;  %v2429_v8 = vrot.slane %v2417_v26, 2  ;;  %v2435_v23 = vrot.slane %v2417_v26, 3  ;;  %v2441_v9 = vrot.slane %v2417_v26, 4  ;;  %vm4696_vm0 = vmmov %vm4694_vm8 }
 0x472   :  { %v2383_v37 = vpop.permute.xlu1 %2382 }
 0x473   :  { %v2396_v33 = vsel %vm2394_vm9, %v2393_v4, %v2383_v37  ;;  %v2653_v37 = vld [vmem:[%s4679_s11] sm:$0xff]  ;;  %v3052_v4 = vpack.c.bf16 %v2658_v48, %v2657_v21 }
 0x474   :  { %v3046_v5 = vpack.c.bf16 %v2654_v7, %v2653_v37 }
 0x476   :  { %v2406_v22 = vpop.permute.xlu1 %2405  ;;  %3047 = vmatpush3.bf16.msra.mxu1 %v3046_v5 }
 0x477   :  { %v2416_v36 = vsel %vm2394_vm9, %v2414_v56, %v2406_v22  ;;  %3048 = vmatprep.subr.bf16.mxu1 %v3147_v52  ;;  %v2659_v56 = vld [vmem:[%s4679_s11 + $0x30] sm:$0xff]  ;;  %v2660_v22 = vld [vmem:[%s4679_s11 + $0x38] sm:$0xff] }
 0x478   :  { %v2418_v62 = vmax.f32 %v2396_v33, %v2416_v36  ;;  %v3055_v33 = vpack.c.bf16 %v2660_v22, %v2659_v56  ;;  %v2661_v36 = vld [vmem:[%s4679_s11 + $0x40] sm:$0xff] }
 0x47a   :  { %v2425_v63 = vsel %vm4692_vm10, %v2418_v62, %v2424_v18  ;;  %v2430_v30 = vrot.slane %v2418_v62, 1  ;;  %v2436_v40 = vrot.slane %v2418_v62, 2  ;;  %v2421_v20 = vrot.slane %v2418_v62, 7 }
 0x47b   :  { %2426 = vrot.lane.b32.xlu0 %v2425_v63, %s3135_s15  ;;  %v2442_v49 = vrot.slane %v2418_v62, 3  ;;  %v2662_v62 = vld [vmem:[%s4679_s11 + $0x48] sm:$0xff]  ;;  %v2663_v63 = vld [vmem:[%s4679_s11 + $0x50] sm:$0xff] }
 0x47c   :  { %v2431_v54 = vsel %vm4693_vm11, %v2430_v30, %v2429_v8  ;;  %v2422_v27 = vsel %vm4694_vm8, %v2421_v20, %v2417_v26  ;;  %v2437_v15 = vsel %vm4695_vm12, %v2436_v40, %v2435_v23  ;;  %v3049_v26 = vpack.c.bf16 %v2656_v44, %v2655_v17  ;;  %v2664_v8 = vld [vmem:[%s4679_s11 + $0x58] sm:$0xff]  ;;  %v2665_v40 = vld [vmem:[%s4679_s11 + $0x60] sm:$0xff]  ;;  %v2666_v20 = vld [vmem:[%s4679_s11 + $0x68] sm:$0xff] }
 0x47d   :  { %2432 = vrot.lane.b32.xlu1 %v2431_v54, %s3148_s1  ;;  %v2443_v61 = vsel %vm4696_vm0, %v2442_v49, %v2441_v9  ;;  %v3058_v18 = vpack.c.bf16 %v2662_v62, %v2661_v36  ;;  %v3061_v30 = vpack.c.bf16 %v2664_v8, %v2663_v63  ;;  %v3064_v54 = vpack.c.bf16 %v2666_v20, %v2665_v40  ;;  %v2667_v23 = vld [vmem:[%s4679_s11 + $0x70] sm:$0xff]  ;;  %v2668_v49 = vld [vmem:[%s4679_s11 + $0x78] sm:$0xff] }
 0x47e   :  { %3050 = vmatpush3.bf16.msra.mxu1 %v3049_v26 }
 0x47f   :  { %2438 = vrot.lane.b32.xlu0 %v2437_v15, %s3143_s6  ;;  %3051 = vmatprep.subr.bf16.mxu1 %v3147_v52 }
 0x481   :  { %2444 = vrot.lane.b32.xlu1 %v2443_v61, %s3145_s8 }
 0x482   :  { %3053 = vmatpush3.bf16.msra.mxu1 %v3052_v4 }
 0x483   :  { %3054 = vmatprep.subr.bf16.mxu1 %v3147_v52 }
 0x486   :  { %3056 = vmatpush3.bf16.msra.mxu1 %v3055_v33 }
 0x487   :  { %3057 = vmatprep.subr.bf16.mxu1 %v3147_v52 }
 0x48a   :  { %3059 = vmatpush3.bf16.msra.mxu1 %v3058_v18 }
 0x48b   :  { %3060 = vmatprep.subr.bf16.mxu1 %v3147_v52 }
 0x48e   :  { %3062 = vmatpush3.bf16.msra.mxu1 %v3061_v30 }
 0x48f   :  { %3063 = vmatprep.subr.bf16.mxu1 %v3147_v52 }
 0x492   :  { %3065 = vmatpush3.bf16.msra.mxu1 %v3064_v54 }
 0x493   :  { %3066 = vmatprep.subr.bf16.mxu1 %v3147_v52 }
 0x4ed   :  { %v2427_v60 = vpop.permute.xlu0 %2426 }
 0x4ee   :  { %v2448_v53 = vsel %vm2447_vm6, %v2422_v27, %v2427_v60  ;;  %v3067_v27 = vpack.c.bf16 %v2668_v49, %v2667_v23 }
 0x4ef   :  { %v2433_v6 = vpop.permute.xlu1 %2432 }
 0x4f0   :  { %v2449_v14 = vsel %vm2389_vm7, %v2427_v60, %v2433_v6  ;;  %3068 = vmatpush3.bf16.msra.mxu1 %v3067_v27 }
 0x4f1   :  { %v2439_v41 = vpop.permute.xlu0 %2438 }
 0x4f2   :  { %v2451_v29 = vsel %vm2450_vm1, %v2449_v14, %v2439_v41 }
 0x4f3   :  { %v2445_v34 = vpop.permute.xlu1 %2444  ;;  %2576 = vmatprep.mubr.f32.mxu0 %v2451_v29 }
 0x4f4   :  { %2577 = vmatmul.mubr.f32.vlgmr.msra.gmra.mrb[14].mxu0 %v2448_v53  ;;  %v2452_v46 = vsel %vm2394_vm9, %v2439_v41, %v2445_v34  ;;  %v2816_v41 = vld [vmem:[%s4680_s12] ss:$0 sm:$0xff] }
 0x4f5   :  { %3020 = vmatpush1.bf16.msra.mxu0 %v3019_v50  ;;  %2815 = vmatprep.mubr.msk.f32.mxu0 %vm2386_vm5, %v2445_v34 }
 0x4f6   :  { %3021 = vmatprep.subr.bf16.mxu0 %v3147_v52 }
 0x4f9   :  { %3023 = vmatpush1.bf16.msra.mxu0 %v3022_v13 }
 0x4fa   :  { %3024 = vmatprep.subr.bf16.mxu0 %v3147_v52 }
 0x4fd   :  { %3026 = vmatpush1.bf16.msra.mxu0 %v3025_v38 }
 0x4fe   :  { %3027 = vmatprep.subr.bf16.mxu0 %v3147_v52 }
 0x501   :  { %3029 = vmatpush1.bf16.msra.mxu0 %v3028_v12 }
 0x502   :  { %3030 = vmatprep.subr.bf16.mxu0 %v3147_v52 }
 0x505   :  { %3032 = vmatpush1.bf16.msra.mxu0 %v3031_v47 }
 0x506   :  { %3033 = vmatprep.subr.bf16.mxu0 %v3147_v52 }
 0x509   :  { %3035 = vmatpush1.bf16.msra.mxu0 %v3034_v1 }
 0x50a   :  { %3036 = vmatprep.subr.bf16.mxu0 %v3147_v52 }
 0x50d   :  { %3038 = vmatpush1.bf16.msra.mxu0 %v3037_v43 }
 0x50e   :  { %3039 = vmatprep.subr.bf16.mxu0 %v3147_v52 }
 0x511   :  { %3041 = vmatpush1.bf16.msra.mxu0 %v3040_v11 }
 0x512   :  { %3042 = vmatprep.subr.bf16.mxu0 %v3147_v52  ;;  %v2814_v52 = vld [vmem:[%s4678_s10] ss:$0 sm:$0xff]  ;;  %s3150_s10 = smov [#allocation2]  }
 0x513   :  { %s2764_s16 = sshll.u32 %s3150_s10, 4  ;;  %s2765_s16 = int_to_ptr.vmem [resolvable:$true] %s2764_s16 }
 0x514   :  { %s3100_s12 = scalar_lea.vmem %s2765_s16, 32  ;;  %p3105_p1 = scmp.lt.s32.totalorder %s2765_s16, %s2765_s16 }
 0x515   :  { %3044 = vmatpush1.bf16.msra.mxu0 %v3043_v10  ;;  %p3101_p0 = scmp.ne.s32.totalorder %s2765_s16, %s3100_s12  ;;  %p3106_p2 = scmp.lt.s32.totalorder %s3100_s12, %s3100_s12 }
 0x517   :  { %p3107_p3 = por %p3106_p2, %p3105_p1 }
 0x518   :  { %2647 = vmatmul.mubr.f32.vlgmr.msra.gmra.mrb[16].mxu0 %v2452_v46 }
 0x519   :  { %p3108_p4 = pnand %p3107_p3, %p3101_p0 }
 0x5c7   :  { %v2849_v15 = vpop.f32.mrb[14].mxu0 }
 0x5c8   :  { %v2850_v9 = vpop.f32.mrb[15].mxu0 }
 0x5c9   :  { %v2851_v61 = vadd.f32 %v2850_v9, %v2849_v15 }
 0x5cb   :  { %v2579_v60 = vadd.f32 %v2851_v61, %v2814_v52 }
 0x5eb   :  { %v2648_v28 = vpop.f32.mrb[16].mxu0 }
 0x5ec   :  { %v2649_v59 = vadd.f32 %v2648_v28, %v2579_v60  ;;  %v2650_v6 = vpop.f32.mrb[17].mxu0 }
 0x5ee   :  { %v2652_v14 = vmax.f32 %v2649_v59, 0.0 }
 0x5f0   :  { %2902 = vmatmul.mubr.f32.vlgmr.msra.gmra.mrb[6].mxu1 %v2652_v14 }
 0x6c3   :  { %v2742_v50 = vpop.f32.mrb[6].mxu1 }
 0x6c4   :  { %v2743_v45 = vadd.f32 %v2816_v41, %v2742_v50  ;;  %v2903_v29 = vpop.f32.mrb[7].mxu1 }
 0x6c6   :  { %v2746_v24 = vsel %vm1931_vm3, %v2743_v45, -inf }
 0x6c7   :  { %2747 = vmax.xlane.f32.xlu0 %v2746_v24 }
 0x754   :  { %v2748_v51 = vpop.xlane.xlu0 %2747 }
 0x755   :  { %v2749_v53 = vsub.f32 %v2743_v45, %v2748_v51 }
 0x757   :  { %v2750_v34 = vmul.f32 1.442695, %v2749_v53 }
 0x759   :  { %3096 = vpow2.f32 %v2750_v34 }
 0x763   :  { %v3097_v13 = vpop.eup %3096 }
 0x764   :  { %v2752_v25 = vsel %vm1931_vm3, %v3097_v13, 0.0 }
 0x765   :  { %2753 = vadd.xlane.f32.xlu1 %v2752_v25 }
 0x7f2   :  { %v2754_v16 = vpop.xlane.xlu1 %2753 }
 0x7f3   :  { %3098 = vrcp.f32 %v2754_v16 }
 0x7fd   :  { %v3099_v38 = vpop.eup %3098 }
 0x7fe   :  { %v2756_v57 = vmul.f32 %v3099_v38, %v3097_v13 }
 0x800   :  { %2757 = vst [vmem:[#allocation2] sm:$0x3] %v2756_v57 }
 0x801   :  { %3111 = shalt.err (!%p3108_p4)
}
 0x802   :  { %s3112_s19 = scalar_lea.hbm %s4681_s13, 32 }
 0x803   :  { %p3113_p5 = scmp.ne.s32.totalorder %s4681_s13, %s3112_s19  ;;  %p3116_p6 = scmp.lt.u32.totalorder %s3112_s19, %s4681_s13 }
 0x805   :  { %p3118_p7 = pnand %p3116_p6, %p3113_p5 }
 0x807   :  { %3121 = shalt.err (!%p3118_p7)
}
 0x808   :  { %2767 = dma.vmem_to_hbm [thread:$0]  %s2765_s16, 32, %s4681_s13, [#allocation3]  }
 0x809   :  { %3122 = dma.done.wait [#allocation3], 32  }
 0x80a   :  { %3123 = vsyncadd [#allocation3], 4294967264 }
 0x80b   :  { %2771 = vsyncpa [#allocation3], 1 }

</bundles_post_ra>
